<compile_context>
chip_gen: v7x
topology: tpu7x:2x2x1
jax: 0.10.0
libtpu: 0.0.40
codegen_flags: <defaults>
</compile_context>

<pallas_src>
import functools  # noqa: F401
import math

import jax
import jax.numpy as jnp
from jax import lax
from jax.experimental import pallas as pl
from jax.experimental.pallas import tpu as pltpu

# ---------------- small config (consistent with the module's __init__) ----------
IMG = 16           # img_size
PATCH = 8          # config.patches['size']
IN_CH = 3          # default in_channels
HIDDEN = 32        # config.hidden_size
NUM_HEADS = 4      # config.transformer['num_heads']
HEAD_DIM = HIDDEN // NUM_HEADS
MLP_DIM = 64       # config.transformer['mlp_dim']
NUM_LAYERS = 2     # config.transformer['num_layers']
NUM_CLASSES = 10   # num_classes (small)
GRID_HW = IMG // PATCH
N_PATCHES = GRID_HW * GRID_HW
SEQ = N_PATCHES + 1              # +1 for cls token
SEQ_PAD = 8                      # per-batch rows padded to a full sublane group
PATCH_DIM = IN_CH * PATCH * PATCH
OUT_PAD = 128                    # lane-dense logits store (>= NUM_CLASSES)
LN_EPS = 1e-6
ATTN_SCALE = 1.0 / math.sqrt(HEAD_DIM)

# bf16 matmul operands (f32 accumulate) = single-pass MXU on v6e/v7x.
# Set to jnp.float32 for strict numerical parity with the f32 PyTorch reference.
MATMUL_DTYPE = jnp.bfloat16


# ------------------------------- kernel helpers ----------------------------------
def _layernorm(x, g, b):
    # PyTorch LayerNorm: biased variance, eps inside sqrt.
    mu = jnp.mean(x, axis=-1, keepdims=True)
    var = jnp.mean(jnp.square(x - mu), axis=-1, keepdims=True)
    return (x - mu) * lax.rsqrt(var + LN_EPS) * g + b


def _gelu_erf(x):
    # PyTorch F.gelu default is the exact erf GELU.  erf via the Abramowitz &
    # Stegun 7.1.26 rational approximation (max abs err ~1.5e-7): plain VPU
    # mul/add + one EUP exp, no reliance on an erf lowering.
    z = x * 0.7071067811865476                      # x / sqrt(2)
    az = jnp.abs(z)
    t = 1.0 / (1.0 + 0.3275911 * az)
    poly = t * (0.254829592 + t * (-0.284496736 + t * (1.421413741
                + t * (-1.453152027 + t * 1.061405429))))
    erf_abs = 1.0 - poly * jnp.exp(-az * az)
    erf = jnp.where(z >= 0.0, erf_abs, -erf_abs)
    return 0.5 * x * (1.0 + erf)


def _mm(a, b):
    # bf16 (or f32) operands, f32 accumulation on the MXU.
    return jnp.dot(a.astype(MATMUL_DTYPE), b.astype(MATMUL_DTYPE),
                   preferred_element_type=jnp.float32)


def _mm_t(a, b):
    # a @ b.T via dot_general dimension numbers (no explicit transpose).
    return lax.dot_general(a.astype(MATMUL_DTYPE), b.astype(MATMUL_DTYPE),
                           (((1,), (1,)), ((), ())),
                           preferred_element_type=jnp.float32)


# ------------------------------- fused Pallas kernel ------------------------------
def vit_forward_kernel(
    patches_ref, addend_ref, valid_ref, hmask_ref,
    patch_w_ref,
    ln1g_ref, ln1b_ref, wqkv_ref, bqkv_ref, wo_ref, bo_ref,
    ln2g_ref, ln2b_ref, w1_ref, b1_ref, w2_ref, b2_ref,
    encg_ref, encb_ref, headw_ref, headb_ref,
    out_ref,
):
    R = patches_ref.shape[0]          # batch * SEQ_PAD (rows of the token slab)
    NEG = -1e30

    # ---- Embeddings: Conv2d(kernel==stride==patch) == one dot + additive tensor.
    # addend already contains cls_token+pos[0] / pos[1:]+conv_bias / 0 (pad rows).
    x = _mm(patches_ref[...], patch_w_ref[...]) + addend_ref[...]      # [R, D] f32
    valid = valid_ref[...]                                             # [H*R, R]
    hmask = hmask_ref[...]                                             # [H, 1, D]
    # dropout == identity (eval mode)

    # ---- Encoder blocks: static unroll over layers, everything VMEM-resident ----
    for l in range(NUM_LAYERS):
        # ----- attention_norm + multi-head self-attention -----
        res = x
        xn = _layernorm(x, ln1g_ref[l], ln1b_ref[l])

        # Fused QKV projection: one [R,32]x[32,96] MXU pass.
        qkv = _mm(xn, wqkv_ref[l]) + bqkv_ref[l]                       # [R, 3D]
        q = qkv[:, 0:HIDDEN]
        k = qkv[:, HIDDEN:2 * HIDDEN]
        v = qkv[:, 2 * HIDDEN:3 * HIDDEN]

        # Stack per-head lane-masked queries along rows (8-aligned blocks), so a
        # single dot produces all (batch, head) score blocks at once.
        qs = jnp.concatenate([q * hmask[h] for h in range(NUM_HEADS)], axis=0)
        s = _mm_t(qs, k) * ATTN_SCALE                                  # [H*R, R]
        # Mask cross-batch / padded key positions (robust to any pad-row values).
        s = jnp.where(valid > 0.5, s, NEG)

        # One batched softmax for all (batch, head) pairs.
        s = s - jnp.max(s, axis=-1, keepdims=True)
        p = jnp.exp(s)
        p = p * pl.reciprocal(jnp.sum(p, axis=-1, keepdims=True), approx=False)

        # One ctx matmul; then merge head blocks onto their lane groups
        # (lane-mask + add replaces the per-head concat / out-proj blocks).
        ctx_all = _mm(p, v)                                            # [H*R, D]
        ctx = ctx_all[0:R] * hmask[0]
        for h in range(1, NUM_HEADS):
            ctx = ctx + ctx_all[h * R:(h + 1) * R] * hmask[h]

        x = _mm(ctx, wo_ref[l]) + bo_ref[l] + res                      # [R, D]

        # ----- ffn_norm + MLP (fc1 -> exact GELU -> fc2); dropout == identity ----
        res = x
        xn = _layernorm(x, ln2g_ref[l], ln2b_ref[l])
        y = _mm(xn, w1_ref[l]) + b1_ref[l]
        y = _gelu_erf(y)
        x = _mm(y, w2_ref[l]) + b2_ref[l] + res

    # ---- encoder_norm + classification head, stored lane-dense [R, 128].
    # Row/lane selection of the cls logits happens in the wrapper (free XLA glue),
    # so the kernel's only HBM write is a full-lane unmasked store.
    xe = _layernorm(x, encg_ref[...], encb_ref[...])
    out_ref[...] = _mm(xe, headw_ref[...]) + headb_ref[...]


# ------------------------------- wrapper ------------------------------------------
@jax.jit
def vit_forward(x, params):
    """x: [B, C, H, W] float32 (NCHW). Returns logits [B, NUM_CLASSES]."""
    B = x.shape[0]
    R = B * SEQ_PAD
    f32 = jnp.float32

    # ---- host-side layout glue: patchify + zero-pad to 8-aligned batch blocks ----
    # Flattening order is (C, ph, pw): a real PyTorch Conv2d weight is loaded as
    # weight.reshape(D, C*ph*pw).T .
    patches = x.reshape(B, IN_CH, GRID_HW, PATCH, GRID_HW, PATCH)
    patches = patches.transpose(0, 2, 4, 1, 3, 5).reshape(B, N_PATCHES, PATCH_DIM)
    patches_pad = jnp.zeros((B, SEQ_PAD, PATCH_DIM), f32)
    patches_pad = patches_pad.at[:, 1:1 + N_PATCHES, :].set(patches)
    patches_pad = patches_pad.reshape(R, PATCH_DIM)

    # Additive embedding tensor: cls_token+pos[0] on cls rows,
    # pos[1:]+conv_bias on patch rows, 0 on pad rows.
    block = jnp.concatenate([
        params["cls_token"] + params["pos_emb"][0:1],
        params["pos_emb"][1:SEQ] + params["patch_b"],
        jnp.zeros((SEQ_PAD - SEQ, HIDDEN), f32),
    ], axis=0)                                                # [SEQ_PAD, D]
    addend = jnp.tile(block, (B, 1))                          # [R, D]

    # Attention validity over key positions: same batch block AND a real token.
    tok = jnp.arange(R)
    same_batch = (tok[:, None] // SEQ_PAD) == (tok[None, :] // SEQ_PAD)
    key_real = (tok[None, :] % SEQ_PAD) < SEQ
    valid = jnp.tile((same_batch & key_real).astype(f32), (NUM_HEADS, 1))  # [H*R, R]

    # Per-head lane masks (which HIDDEN lanes belong to head h).
    hmask = (jnp.arange(HIDDEN)[None, :] // HEAD_DIM
             == jnp.arange(NUM_HEADS)[:, None]).astype(f32)
    hmask = hmask.reshape(NUM_HEADS, 1, HIDDEN)

    # Lane-dense head: zero-pad to 128 output lanes.
    head_w = jnp.zeros((HIDDEN, OUT_PAD), f32).at[:, :NUM_CLASSES].set(params["head_w"])
    head_b = jnp.zeros((1, OUT_PAD), f32).at[:, :NUM_CLASSES].set(params["head_b"])

    cw = lambda w: w.astype(MATMUL_DTYPE)   # matmul-operand weights

    out = pl.pallas_call(
        vit_forward_kernel,
        out_shape=jax.ShapeDtypeStruct((R, OUT_PAD), f32),
        # Fully VMEM-resident, grid-less; limit documents the (tiny) budget.
        compiler_params=pltpu.CompilerParams(vmem_limit_bytes=32 * 1024 * 1024),
    )(
        patches_pad, addend, valid, hmask,
        cw(params["patch_w"]),
        params["ln1_g"], params["ln1_b"],
        cw(params["w_qkv"]), params["b_qkv"],
        cw(params["w_o"]), params["b_o"],
        params["ln2_g"], params["ln2_b"],
        cw(params["w1"]), params["b1"],
        cw(params["w2"]), params["b2"],
        params["enc_g"], params["enc_b"],
        cw(head_w), head_b,
    )
    # cls rows sit at row b*SEQ_PAD; slice logits lanes. Pure XLA glue.
    return out.reshape(B, SEQ_PAD, OUT_PAD)[:, 0, :NUM_CLASSES]


# ------------------------------- parameter init ----------------------------------
def init_params(key):
    keys = iter(jax.random.split(key, 32))

    def nrm(shape, scale=0.02):
        return (scale * jax.random.normal(next(keys), shape)).astype(jnp.float32)

    L = NUM_LAYERS
    # Per-layer weights stacked on a leading [L, ...] axis.  All linear weights
    # are stored in x @ W layout (i.e. PyTorch W.T).  The fused QKV weight is
    # concat([Wq.T, Wk.T, Wv.T], axis=-1); head ordering within each 32-lane
    # group is the natural (head, head_dim) split of transpose_for_scores.
    return {
        "patch_w": nrm((PATCH_DIM, HIDDEN)),   # Conv2d weight flattened (C*ph*pw, D)
        "patch_b": nrm((1, HIDDEN)),
        "cls_token": nrm((1, HIDDEN)),
        "pos_emb": nrm((SEQ, HIDDEN)),
        "ln1_g": jnp.ones((L, 1, HIDDEN), jnp.float32),
        "ln1_b": jnp.zeros((L, 1, HIDDEN), jnp.float32),
        "w_qkv": nrm((L, HIDDEN, 3 * HIDDEN)),
        "b_qkv": nrm((L, 1, 3 * HIDDEN)),
        "w_o": nrm((L, HIDDEN, HIDDEN)),
        "b_o": nrm((L, 1, HIDDEN)),
        "ln2_g": jnp.ones((L, 1, HIDDEN), jnp.float32),
        "ln2_b": jnp.zeros((L, 1, HIDDEN), jnp.float32),
        "w1": nrm((L, HIDDEN, MLP_DIM)),
        "b1": nrm((L, 1, MLP_DIM)),
        "w2": nrm((L, MLP_DIM, HIDDEN)),
        "b2": nrm((L, 1, HIDDEN)),
        "enc_g": jnp.ones((1, HIDDEN), jnp.float32),
        "enc_b": jnp.zeros((1, HIDDEN), jnp.float32),
        "head_w": nrm((HIDDEN, NUM_CLASSES)),
        "head_b": nrm((1, NUM_CLASSES)),
    }


# ------------------------------- main ---------------------------------------------
if __name__ == "__main__":
    root_key = jax.random.PRNGKey(0)
    k_params, k_x = jax.random.split(root_key)
    params = init_params(k_params)
    x = jax.random.normal(k_x, (2, IN_CH, IMG, IMG), dtype=jnp.float32)  # NCHW

    logits = vit_forward(x, params)
    logits = jax.block_until_ready(logits)
    assert logits.shape == (2, NUM_CLASSES)
    assert bool(jnp.all(jnp.isfinite(logits)))
    print("KERNEL_OK")
</pallas_src>

<mosaic_0001>
module attributes {stable_mosaic.version = 11 : i64} {
  func.func @vit_forward_kernel(%arg0: memref<16x192xf32, #tpu.memory_space<vmem>>, %arg1: memref<16x32xf32, #tpu.memory_space<vmem>>, %arg2: memref<64x16xf32, #tpu.memory_space<vmem>>, %arg3: memref<4x1x32xf32, #tpu.memory_space<vmem>>, %arg4: memref<192x32xbf16, #tpu.memory_space<vmem>>, %arg5: memref<2x1x32xf32, #tpu.memory_space<vmem>>, %arg6: memref<2x1x32xf32, #tpu.memory_space<vmem>>, %arg7: memref<2x32x96xbf16, #tpu.memory_space<vmem>>, %arg8: memref<2x1x96xf32, #tpu.memory_space<vmem>>, %arg9: memref<2x32x32xbf16, #tpu.memory_space<vmem>>, %arg10: memref<2x1x32xf32, #tpu.memory_space<vmem>>, %arg11: memref<2x1x32xf32, #tpu.memory_space<vmem>>, %arg12: memref<2x1x32xf32, #tpu.memory_space<vmem>>, %arg13: memref<2x32x64xbf16, #tpu.memory_space<vmem>>, %arg14: memref<2x1x64xf32, #tpu.memory_space<vmem>>, %arg15: memref<2x64x32xbf16, #tpu.memory_space<vmem>>, %arg16: memref<2x1x32xf32, #tpu.memory_space<vmem>>, %arg17: memref<1x32xf32, #tpu.memory_space<vmem>>, %arg18: memref<1x32xf32, #tpu.memory_space<vmem>>, %arg19: memref<32x128xbf16, #tpu.memory_space<vmem>>, %arg20: memref<1x128xf32, #tpu.memory_space<vmem>>, %arg21: memref<16x128xf32, #tpu.memory_space<vmem>>) attributes {dimension_semantics = [], scalar_prefetch = 0 : i64, scratch_operands = 0 : i64, tpu.core_type = #tpu.core_type<tc>} {
    %c0 = arith.constant 0 : index
    %c0_0 = arith.constant 0 : index
    %0 = vector.load %arg0[%c0, %c0_0] : memref<16x192xf32, #tpu.memory_space<vmem>>, vector<16x192xf32>
    %c0_1 = arith.constant 0 : index
    %c0_2 = arith.constant 0 : index
    %1 = vector.load %arg4[%c0_1, %c0_2] : memref<192x32xbf16, #tpu.memory_space<vmem>>, vector<192x32xbf16>
    %2 = arith.truncf %0 : vector<16x192xf32> to vector<16x192xbf16>
    %cst = arith.constant dense<0.000000e+00> : vector<16x32xf32>
    %3 = tpu.matmul %2, %1, %cst {dimension_numbers = #tpu.dot_dimension_numbers<[1], [0], [0], [1], [0, 0, 1, 1], [], []>} : vector<16x192xbf16>, vector<192x32xbf16>, vector<16x32xf32> -> vector<16x32xf32>
    %c0_3 = arith.constant 0 : index
    %c0_4 = arith.constant 0 : index
    %4 = vector.load %arg1[%c0_3, %c0_4] : memref<16x32xf32, #tpu.memory_space<vmem>>, vector<16x32xf32>
    %5 = arith.addf %3, %4 : vector<16x32xf32>
    %c0_5 = arith.constant 0 : index
    %c0_6 = arith.constant 0 : index
    %6 = vector.load %arg2[%c0_5, %c0_6] : memref<64x16xf32, #tpu.memory_space<vmem>>, vector<64x16xf32>
    %c0_7 = arith.constant 0 : index
    %c0_8 = arith.constant 0 : index
    %c0_9 = arith.constant 0 : index
    %7 = vector.load %arg3[%c0_7, %c0_8, %c0_9] : memref<4x1x32xf32, #tpu.memory_space<vmem>>, vector<4x1x32xf32>
    %c0_10 = arith.constant 0 : index
    %c0_11 = arith.constant 0 : index
    %c0_12 = arith.constant 0 : index
    %8 = vector.load %arg5[%c0_10, %c0_11, %c0_12] : memref<2x1x32xf32, #tpu.memory_space<vmem>>, vector<1x1x32xf32>
    %9 = vector.shape_cast %8 : vector<1x1x32xf32> to vector<1x32xf32>
    %c0_13 = arith.constant 0 : index
    %c0_14 = arith.constant 0 : index
    %c0_15 = arith.constant 0 : index
    %10 = vector.load %arg6[%c0_13, %c0_14, %c0_15] : memref<2x1x32xf32, #tpu.memory_space<vmem>>, vector<1x1x32xf32>
    %11 = vector.shape_cast %10 : vector<1x1x32xf32> to vector<1x32xf32>
    %cst_16 = arith.constant dense<0.000000e+00> : vector<16xf32>
    %12 = vector.multi_reduction <add>, %5, %cst_16 [1] : vector<16x32xf32> to vector<16xf32>
    %13 = vector.shape_cast %12 : vector<16xf32> to vector<16x1xf32>
    %cst_17 = arith.constant 3.200000e+01 : f32
    %14 = vector.broadcast %cst_17 : f32 to vector<16x1xf32>
    %15 = arith.divf %13, %14 : vector<16x1xf32>
    %16 = vector.broadcast %15 : vector<16x1xf32> to vector<16x32xf32>
    %17 = arith.subf %5, %16 : vector<16x32xf32>
    %18 = arith.mulf %17, %17 : vector<16x32xf32>
    %cst_18 = arith.constant dense<0.000000e+00> : vector<16xf32>
    %19 = vector.multi_reduction <add>, %18, %cst_18 [1] : vector<16x32xf32> to vector<16xf32>
    %20 = vector.shape_cast %19 : vector<16xf32> to vector<16x1xf32>
    %cst_19 = arith.constant 3.200000e+01 : f32
    %21 = vector.broadcast %cst_19 : f32 to vector<16x1xf32>
    %22 = arith.divf %20, %21 : vector<16x1xf32>
    %23 = vector.broadcast %15 : vector<16x1xf32> to vector<16x32xf32>
    %24 = arith.subf %5, %23 : vector<16x32xf32>
    %cst_20 = arith.constant 9.99999997E-7 : f32
    %25 = vector.broadcast %cst_20 : f32 to vector<16x1xf32>
    %26 = arith.addf %22, %25 : vector<16x1xf32>
    %27 = math.rsqrt %26 : vector<16x1xf32>
    %28 = vector.broadcast %27 : vector<16x1xf32> to vector<16x32xf32>
    %29 = arith.mulf %24, %28 : vector<16x32xf32>
    %30 = vector.broadcast %9 : vector<1x32xf32> to vector<16x32xf32>
    %31 = arith.mulf %29, %30 : vector<16x32xf32>
    %32 = vector.broadcast %11 : vector<1x32xf32> to vector<16x32xf32>
    %33 = arith.addf %31, %32 : vector<16x32xf32>
    %c0_21 = arith.constant 0 : index
    %c0_22 = arith.constant 0 : index
    %c0_23 = arith.constant 0 : index
    %34 = vector.load %arg7[%c0_21, %c0_22, %c0_23] : memref<2x32x96xbf16, #tpu.memory_space<vmem>>, vector<1x32x96xbf16>
    %35 = vector.shape_cast %34 : vector<1x32x96xbf16> to vector<32x96xbf16>
    %36 = arith.truncf %33 : vector<16x32xf32> to vector<16x32xbf16>
    %cst_24 = arith.constant dense<0.000000e+00> : vector<16x96xf32>
    %37 = tpu.matmul %36, %35, %cst_24 {dimension_numbers = #tpu.dot_dimension_numbers<[1], [0], [0], [1], [0, 0, 1, 1], [], []>} : vector<16x32xbf16>, vector<32x96xbf16>, vector<16x96xf32> -> vector<16x96xf32>
    %c0_25 = arith.constant 0 : index
    %c0_26 = arith.constant 0 : index
    %c0_27 = arith.constant 0 : index
    %38 = vector.load %arg8[%c0_25, %c0_26, %c0_27] : memref<2x1x96xf32, #tpu.memory_space<vmem>>, vector<1x1x96xf32>
    %39 = vector.shape_cast %38 : vector<1x1x96xf32> to vector<1x96xf32>
    %40 = vector.broadcast %39 : vector<1x96xf32> to vector<16x96xf32>
    %41 = arith.addf %37, %40 : vector<16x96xf32>
    %42 = vector.extract_strided_slice %41 {offsets = [0, 0], sizes = [16, 32], strides = [1, 1]} : vector<16x96xf32> to vector<16x32xf32>
    %43 = vector.extract_strided_slice %41 {offsets = [0, 32], sizes = [16, 32], strides = [1, 1]} : vector<16x96xf32> to vector<16x32xf32>
    %44 = vector.extract_strided_slice %41 {offsets = [0, 64], sizes = [16, 32], strides = [1, 1]} : vector<16x96xf32> to vector<16x32xf32>
    %45 = vector.extract_strided_slice %7 {offsets = [0, 0, 0], sizes = [1, 1, 32], strides = [1, 1, 1]} : vector<4x1x32xf32> to vector<1x1x32xf32>
    %46 = vector.shape_cast %45 : vector<1x1x32xf32> to vector<1x32xf32>
    %47 = vector.broadcast %46 : vector<1x32xf32> to vector<16x32xf32>
    %48 = arith.mulf %42, %47 : vector<16x32xf32>
    %49 = vector.extract_strided_slice %7 {offsets = [1, 0, 0], sizes = [1, 1, 32], strides = [1, 1, 1]} : vector<4x1x32xf32> to vector<1x1x32xf32>
    %50 = vector.shape_cast %49 : vector<1x1x32xf32> to vector<1x32xf32>
    %51 = vector.broadcast %50 : vector<1x32xf32> to vector<16x32xf32>
    %52 = arith.mulf %42, %51 : vector<16x32xf32>
    %53 = vector.extract_strided_slice %7 {offsets = [2, 0, 0], sizes = [1, 1, 32], strides = [1, 1, 1]} : vector<4x1x32xf32> to vector<1x1x32xf32>
    %54 = vector.shape_cast %53 : vector<1x1x32xf32> to vector<1x32xf32>
    %55 = vector.broadcast %54 : vector<1x32xf32> to vector<16x32xf32>
    %56 = arith.mulf %42, %55 : vector<16x32xf32>
    %57 = vector.extract_strided_slice %7 {offsets = [3, 0, 0], sizes = [1, 1, 32], strides = [1, 1, 1]} : vector<4x1x32xf32> to vector<1x1x32xf32>
    %58 = vector.shape_cast %57 : vector<1x1x32xf32> to vector<1x32xf32>
    %59 = vector.broadcast %58 : vector<1x32xf32> to vector<16x32xf32>
    %60 = arith.mulf %42, %59 : vector<16x32xf32>
    %61 = tpu.concatenate %48, %52, %56, %60 in 0 : vector<16x32xf32>, vector<16x32xf32>, vector<16x32xf32>, vector<16x32xf32> -> vector<64x32xf32>
    %62 = arith.truncf %61 : vector<64x32xf32> to vector<64x32xbf16>
    %63 = arith.truncf %43 : vector<16x32xf32> to vector<16x32xbf16>
    %cst_28 = arith.constant dense<0.000000e+00> : vector<64x16xf32>
    %64 = tpu.matmul %62, %63, %cst_28 {dimension_numbers = #tpu.dot_dimension_numbers<[1], [1], [0], [0], [0, 0, 1, 0], [], []>} : vector<64x32xbf16>, vector<16x32xbf16>, vector<64x16xf32> -> vector<64x16xf32>
    %cst_29 = arith.constant 0.353553385 : f32
    %65 = vector.broadcast %cst_29 : f32 to vector<64x16xf32>
    %66 = arith.mulf %64, %65 : vector<64x16xf32>
    %cst_30 = arith.constant 5.000000e-01 : f32
    %67 = vector.broadcast %cst_30 : f32 to vector<64x16xf32>
    %68 = arith.cmpf ogt, %6, %67 : vector<64x16xf32>
    %cst_31 = arith.constant -1.000000e+30 : f32
    %69 = vector.broadcast %cst_31 : f32 to vector<64x16xf32>
    %70 = arith.select %68, %66, %69 : vector<64x16xi1>, vector<64x16xf32>
    %cst_32 = arith.constant dense<0xFF800000> : vector<64xf32>
    %71 = vector.multi_reduction <maximumf>, %70, %cst_32 [1] : vector<64x16xf32> to vector<64xf32>
    %72 = vector.shape_cast %71 : vector<64xf32> to vector<64x1xf32>
    %73 = vector.broadcast %72 : vector<64x1xf32> to vector<64x16xf32>
    %74 = arith.subf %70, %73 : vector<64x16xf32>
    %75 = math.exp %74 : vector<64x16xf32>
    %cst_33 = arith.constant dense<0.000000e+00> : vector<64xf32>
    %76 = vector.multi_reduction <add>, %75, %cst_33 [1] : vector<64x16xf32> to vector<64xf32>
    %77 = vector.shape_cast %76 : vector<64xf32> to vector<64x1xf32>
    %78 = tpu.reciprocal %77 : vector<64x1xf32> -> vector<64x1xf32>
    %79 = vector.broadcast %78 : vector<64x1xf32> to vector<64x16xf32>
    %80 = arith.mulf %75, %79 : vector<64x16xf32>
    %81 = arith.truncf %80 : vector<64x16xf32> to vector<64x16xbf16>
    %82 = arith.truncf %44 : vector<16x32xf32> to vector<16x32xbf16>
    %cst_34 = arith.constant dense<0.000000e+00> : vector<64x32xf32>
    %83 = tpu.matmul %81, %82, %cst_34 {dimension_numbers = #tpu.dot_dimension_numbers<[1], [0], [0], [1], [0, 0, 1, 1], [], []>} : vector<64x16xbf16>, vector<16x32xbf16>, vector<64x32xf32> -> vector<64x32xf32>
    %84 = vector.extract_strided_slice %83 {offsets = [0, 0], sizes = [16, 32], strides = [1, 1]} : vector<64x32xf32> to vector<16x32xf32>
    %85 = vector.extract_strided_slice %7 {offsets = [0, 0, 0], sizes = [1, 1, 32], strides = [1, 1, 1]} : vector<4x1x32xf32> to vector<1x1x32xf32>
    %86 = vector.shape_cast %85 : vector<1x1x32xf32> to vector<1x32xf32>
    %87 = vector.broadcast %86 : vector<1x32xf32> to vector<16x32xf32>
    %88 = arith.mulf %84, %87 : vector<16x32xf32>
    %89 = vector.extract_strided_slice %83 {offsets = [16, 0], sizes = [16, 32], strides = [1, 1]} : vector<64x32xf32> to vector<16x32xf32>
    %90 = vector.extract_strided_slice %7 {offsets = [1, 0, 0], sizes = [1, 1, 32], strides = [1, 1, 1]} : vector<4x1x32xf32> to vector<1x1x32xf32>
    %91 = vector.shape_cast %90 : vector<1x1x32xf32> to vector<1x32xf32>
    %92 = vector.broadcast %91 : vector<1x32xf32> to vector<16x32xf32>
    %93 = arith.mulf %89, %92 : vector<16x32xf32>
    %94 = arith.addf %88, %93 : vector<16x32xf32>
    %95 = vector.extract_strided_slice %83 {offsets = [32, 0], sizes = [16, 32], strides = [1, 1]} : vector<64x32xf32> to vector<16x32xf32>
    %96 = vector.extract_strided_slice %7 {offsets = [2, 0, 0], sizes = [1, 1, 32], strides = [1, 1, 1]} : vector<4x1x32xf32> to vector<1x1x32xf32>
    %97 = vector.shape_cast %96 : vector<1x1x32xf32> to vector<1x32xf32>
    %98 = vector.broadcast %97 : vector<1x32xf32> to vector<16x32xf32>
    %99 = arith.mulf %95, %98 : vector<16x32xf32>
    %100 = arith.addf %94, %99 : vector<16x32xf32>
    %101 = vector.extract_strided_slice %83 {offsets = [48, 0], sizes = [16, 32], strides = [1, 1]} : vector<64x32xf32> to vector<16x32xf32>
    %102 = vector.extract_strided_slice %7 {offsets = [3, 0, 0], sizes = [1, 1, 32], strides = [1, 1, 1]} : vector<4x1x32xf32> to vector<1x1x32xf32>
    %103 = vector.shape_cast %102 : vector<1x1x32xf32> to vector<1x32xf32>
    %104 = vector.broadcast %103 : vector<1x32xf32> to vector<16x32xf32>
    %105 = arith.mulf %101, %104 : vector<16x32xf32>
    %106 = arith.addf %100, %105 : vector<16x32xf32>
    %c0_35 = arith.constant 0 : index
    %c0_36 = arith.constant 0 : index
    %c0_37 = arith.constant 0 : index
    %107 = vector.load %arg9[%c0_35, %c0_36, %c0_37] : memref<2x32x32xbf16, #tpu.memory_space<vmem>>, vector<1x32x32xbf16>
    %108 = vector.shape_cast %107 : vector<1x32x32xbf16> to vector<32x32xbf16>
    %109 = arith.truncf %106 : vector<16x32xf32> to vector<16x32xbf16>
    %cst_38 = arith.constant dense<0.000000e+00> : vector<16x32xf32>
    %110 = tpu.matmul %109, %108, %cst_38 {dimension_numbers = #tpu.dot_dimension_numbers<[1], [0], [0], [1], [0, 0, 1, 1], [], []>} : vector<16x32xbf16>, vector<32x32xbf16>, vector<16x32xf32> -> vector<16x32xf32>
    %c0_39 = arith.constant 0 : index
    %c0_40 = arith.constant 0 : index
    %c0_41 = arith.constant 0 : index
    %111 = vector.load %arg10[%c0_39, %c0_40, %c0_41] : memref<2x1x32xf32, #tpu.memory_space<vmem>>, vector<1x1x32xf32>
    %112 = vector.shape_cast %111 : vector<1x1x32xf32> to vector<1x32xf32>
    %113 = vector.broadcast %112 : vector<1x32xf32> to vector<16x32xf32>
    %114 = arith.addf %110, %113 : vector<16x32xf32>
    %115 = arith.addf %114, %5 : vector<16x32xf32>
    %c0_42 = arith.constant 0 : index
    %c0_43 = arith.constant 0 : index
    %c0_44 = arith.constant 0 : index
    %116 = vector.load %arg11[%c0_42, %c0_43, %c0_44] : memref<2x1x32xf32, #tpu.memory_space<vmem>>, vector<1x1x32xf32>
    %117 = vector.shape_cast %116 : vector<1x1x32xf32> to vector<1x32xf32>
    %c0_45 = arith.constant 0 : index
    %c0_46 = arith.constant 0 : index
    %c0_47 = arith.constant 0 : index
    %118 = vector.load %arg12[%c0_45, %c0_46, %c0_47] : memref<2x1x32xf32, #tpu.memory_space<vmem>>, vector<1x1x32xf32>
    %119 = vector.shape_cast %118 : vector<1x1x32xf32> to vector<1x32xf32>
    %cst_48 = arith.constant dense<0.000000e+00> : vector<16xf32>
    %120 = vector.multi_reduction <add>, %115, %cst_48 [1] : vector<16x32xf32> to vector<16xf32>
    %121 = vector.shape_cast %120 : vector<16xf32> to vector<16x1xf32>
    %cst_49 = arith.constant 3.200000e+01 : f32
    %122 = vector.broadcast %cst_49 : f32 to vector<16x1xf32>
    %123 = arith.divf %121, %122 : vector<16x1xf32>
    %124 = vector.broadcast %123 : vector<16x1xf32> to vector<16x32xf32>
    %125 = arith.subf %115, %124 : vector<16x32xf32>
    %126 = arith.mulf %125, %125 : vector<16x32xf32>
    %cst_50 = arith.constant dense<0.000000e+00> : vector<16xf32>
    %127 = vector.multi_reduction <add>, %126, %cst_50 [1] : vector<16x32xf32> to vector<16xf32>
    %128 = vector.shape_cast %127 : vector<16xf32> to vector<16x1xf32>
    %cst_51 = arith.constant 3.200000e+01 : f32
    %129 = vector.broadcast %cst_51 : f32 to vector<16x1xf32>
    %130 = arith.divf %128, %129 : vector<16x1xf32>
    %131 = vector.broadcast %123 : vector<16x1xf32> to vector<16x32xf32>
    %132 = arith.subf %115, %131 : vector<16x32xf32>
    %cst_52 = arith.constant 9.99999997E-7 : f32
    %133 = vector.broadcast %cst_52 : f32 to vector<16x1xf32>
    %134 = arith.addf %130, %133 : vector<16x1xf32>
    %135 = math.rsqrt %134 : vector<16x1xf32>
    %136 = vector.broadcast %135 : vector<16x1xf32> to vector<16x32xf32>
    %137 = arith.mulf %132, %136 : vector<16x32xf32>
    %138 = vector.broadcast %117 : vector<1x32xf32> to vector<16x32xf32>
    %139 = arith.mulf %137, %138 : vector<16x32xf32>
    %140 = vector.broadcast %119 : vector<1x32xf32> to vector<16x32xf32>
    %141 = arith.addf %139, %140 : vector<16x32xf32>
    %c0_53 = arith.constant 0 : index
    %c0_54 = arith.constant 0 : index
    %c0_55 = arith.constant 0 : index
    %142 = vector.load %arg13[%c0_53, %c0_54, %c0_55] : memref<2x32x64xbf16, #tpu.memory_space<vmem>>, vector<1x32x64xbf16>
    %143 = vector.shape_cast %142 : vector<1x32x64xbf16> to vector<32x64xbf16>
    %144 = arith.truncf %141 : vector<16x32xf32> to vector<16x32xbf16>
    %cst_56 = arith.constant dense<0.000000e+00> : vector<16x64xf32>
    %145 = tpu.matmul %144, %143, %cst_56 {dimension_numbers = #tpu.dot_dimension_numbers<[1], [0], [0], [1], [0, 0, 1, 1], [], []>} : vector<16x32xbf16>, vector<32x64xbf16>, vector<16x64xf32> -> vector<16x64xf32>
    %c0_57 = arith.constant 0 : index
    %c0_58 = arith.constant 0 : index
    %c0_59 = arith.constant 0 : index
    %146 = vector.load %arg14[%c0_57, %c0_58, %c0_59] : memref<2x1x64xf32, #tpu.memory_space<vmem>>, vector<1x1x64xf32>
    %147 = vector.shape_cast %146 : vector<1x1x64xf32> to vector<1x64xf32>
    %148 = vector.broadcast %147 : vector<1x64xf32> to vector<16x64xf32>
    %149 = arith.addf %145, %148 : vector<16x64xf32>
    %cst_60 = arith.constant 0.707106769 : f32
    %150 = vector.broadcast %cst_60 : f32 to vector<16x64xf32>
    %151 = arith.mulf %149, %150 : vector<16x64xf32>
    %152 = math.absf %151 : vector<16x64xf32>
    %cst_61 = arith.constant 0.327591091 : f32
    %153 = vector.broadcast %cst_61 : f32 to vector<16x64xf32>
    %154 = arith.mulf %153, %152 : vector<16x64xf32>
    %cst_62 = arith.constant 1.000000e+00 : f32
    %155 = vector.broadcast %cst_62 : f32 to vector<16x64xf32>
    %156 = arith.addf %155, %154 : vector<16x64xf32>
    %cst_63 = arith.constant 1.000000e+00 : f32
    %157 = vector.broadcast %cst_63 : f32 to vector<16x64xf32>
    %158 = arith.divf %157, %156 : vector<16x64xf32>
    %cst_64 = arith.constant 1.06140542 : f32
    %159 = vector.broadcast %cst_64 : f32 to vector<16x64xf32>
    %160 = arith.mulf %158, %159 : vector<16x64xf32>
    %cst_65 = arith.constant -1.45315206 : f32
    %161 = vector.broadcast %cst_65 : f32 to vector<16x64xf32>
    %162 = arith.addf %161, %160 : vector<16x64xf32>
    %163 = arith.mulf %158, %162 : vector<16x64xf32>
    %cst_66 = arith.constant 1.42141378 : f32
    %164 = vector.broadcast %cst_66 : f32 to vector<16x64xf32>
    %165 = arith.addf %164, %163 : vector<16x64xf32>
    %166 = arith.mulf %158, %165 : vector<16x64xf32>
    %cst_67 = arith.constant -0.284496725 : f32
    %167 = vector.broadcast %cst_67 : f32 to vector<16x64xf32>
    %168 = arith.addf %167, %166 : vector<16x64xf32>
    %169 = arith.mulf %158, %168 : vector<16x64xf32>
    %cst_68 = arith.constant 0.254829586 : f32
    %170 = vector.broadcast %cst_68 : f32 to vector<16x64xf32>
    %171 = arith.addf %170, %169 : vector<16x64xf32>
    %172 = arith.mulf %158, %171 : vector<16x64xf32>
    %cst_69 = arith.constant 0.000000e+00 : f32
    %173 = vector.broadcast %cst_69 : f32 to vector<16x64xf32>
    %174 = arith.subf %173, %152 : vector<16x64xf32>
    %175 = arith.mulf %174, %152 : vector<16x64xf32>
    %176 = math.exp %175 : vector<16x64xf32>
    %177 = arith.mulf %172, %176 : vector<16x64xf32>
    %cst_70 = arith.constant 1.000000e+00 : f32
    %178 = vector.broadcast %cst_70 : f32 to vector<16x64xf32>
    %179 = arith.subf %178, %177 : vector<16x64xf32>
    %cst_71 = arith.constant 0.000000e+00 : f32
    %180 = vector.broadcast %cst_71 : f32 to vector<16x64xf32>
    %181 = arith.cmpf oge, %151, %180 : vector<16x64xf32>
    %cst_72 = arith.constant 0.000000e+00 : f32
    %182 = vector.broadcast %cst_72 : f32 to vector<16x64xf32>
    %183 = arith.subf %182, %179 : vector<16x64xf32>
    %184 = arith.select %181, %179, %183 : vector<16x64xi1>, vector<16x64xf32>
    %cst_73 = arith.constant 5.000000e-01 : f32
    %185 = vector.broadcast %cst_73 : f32 to vector<16x64xf32>
    %186 = arith.mulf %185, %149 : vector<16x64xf32>
    %cst_74 = arith.constant 1.000000e+00 : f32
    %187 = vector.broadcast %cst_74 : f32 to vector<16x64xf32>
    %188 = arith.addf %187, %184 : vector<16x64xf32>
    %189 = arith.mulf %186, %188 : vector<16x64xf32>
    %c0_75 = arith.constant 0 : index
    %c0_76 = arith.constant 0 : index
    %c0_77 = arith.constant 0 : index
    %190 = vector.load %arg15[%c0_75, %c0_76, %c0_77] : memref<2x64x32xbf16, #tpu.memory_space<vmem>>, vector<1x64x32xbf16>
    %191 = vector.shape_cast %190 : vector<1x64x32xbf16> to vector<64x32xbf16>
    %192 = arith.truncf %189 : vector<16x64xf32> to vector<16x64xbf16>
    %cst_78 = arith.constant dense<0.000000e+00> : vector<16x32xf32>
    %193 = tpu.matmul %192, %191, %cst_78 {dimension_numbers = #tpu.dot_dimension_numbers<[1], [0], [0], [1], [0, 0, 1, 1], [], []>} : vector<16x64xbf16>, vector<64x32xbf16>, vector<16x32xf32> -> vector<16x32xf32>
    %c0_79 = arith.constant 0 : index
    %c0_80 = arith.constant 0 : index
    %c0_81 = arith.constant 0 : index
    %194 = vector.load %arg16[%c0_79, %c0_80, %c0_81] : memref<2x1x32xf32, #tpu.memory_space<vmem>>, vector<1x1x32xf32>
    %195 = vector.shape_cast %194 : vector<1x1x32xf32> to vector<1x32xf32>
    %196 = vector.broadcast %195 : vector<1x32xf32> to vector<16x32xf32>
    %197 = arith.addf %193, %196 : vector<16x32xf32>
    %198 = arith.addf %197, %115 : vector<16x32xf32>
    %c1 = arith.constant 1 : index
    %c0_82 = arith.constant 0 : index
    %c0_83 = arith.constant 0 : index
    %199 = vector.load %arg5[%c1, %c0_82, %c0_83] : memref<2x1x32xf32, #tpu.memory_space<vmem>>, vector<1x1x32xf32>
    %200 = vector.shape_cast %199 : vector<1x1x32xf32> to vector<1x32xf32>
    %c1_84 = arith.constant 1 : index
    %c0_85 = arith.constant 0 : index
    %c0_86 = arith.constant 0 : index
    %201 = vector.load %arg6[%c1_84, %c0_85, %c0_86] : memref<2x1x32xf32, #tpu.memory_space<vmem>>, vector<1x1x32xf32>
    %202 = vector.shape_cast %201 : vector<1x1x32xf32> to vector<1x32xf32>
    %cst_87 = arith.constant dense<0.000000e+00> : vector<16xf32>
    %203 = vector.multi_reduction <add>, %198, %cst_87 [1] : vector<16x32xf32> to vector<16xf32>
    %204 = vector.shape_cast %203 : vector<16xf32> to vector<16x1xf32>
    %cst_88 = arith.constant 3.200000e+01 : f32
    %205 = vector.broadcast %cst_88 : f32 to vector<16x1xf32>
    %206 = arith.divf %204, %205 : vector<16x1xf32>
    %207 = vector.broadcast %206 : vector<16x1xf32> to vector<16x32xf32>
    %208 = arith.subf %198, %207 : vector<16x32xf32>
    %209 = arith.mulf %208, %208 : vector<16x32xf32>
    %cst_89 = arith.constant dense<0.000000e+00> : vector<16xf32>
    %210 = vector.multi_reduction <add>, %209, %cst_89 [1] : vector<16x32xf32> to vector<16xf32>
    %211 = vector.shape_cast %210 : vector<16xf32> to vector<16x1xf32>
    %cst_90 = arith.constant 3.200000e+01 : f32
    %212 = vector.broadcast %cst_90 : f32 to vector<16x1xf32>
    %213 = arith.divf %211, %212 : vector<16x1xf32>
    %214 = vector.broadcast %206 : vector<16x1xf32> to vector<16x32xf32>
    %215 = arith.subf %198, %214 : vector<16x32xf32>
    %cst_91 = arith.constant 9.99999997E-7 : f32
    %216 = vector.broadcast %cst_91 : f32 to vector<16x1xf32>
    %217 = arith.addf %213, %216 : vector<16x1xf32>
    %218 = math.rsqrt %217 : vector<16x1xf32>
    %219 = vector.broadcast %218 : vector<16x1xf32> to vector<16x32xf32>
    %220 = arith.mulf %215, %219 : vector<16x32xf32>
    %221 = vector.broadcast %200 : vector<1x32xf32> to vector<16x32xf32>
    %222 = arith.mulf %220, %221 : vector<16x32xf32>
    %223 = vector.broadcast %202 : vector<1x32xf32> to vector<16x32xf32>
    %224 = arith.addf %222, %223 : vector<16x32xf32>
    %c1_92 = arith.constant 1 : index
    %c0_93 = arith.constant 0 : index
    %c0_94 = arith.constant 0 : index
    %225 = vector.load %arg7[%c1_92, %c0_93, %c0_94] : memref<2x32x96xbf16, #tpu.memory_space<vmem>>, vector<1x32x96xbf16>
    %226 = vector.shape_cast %225 : vector<1x32x96xbf16> to vector<32x96xbf16>
    %227 = arith.truncf %224 : vector<16x32xf32> to vector<16x32xbf16>
    %cst_95 = arith.constant dense<0.000000e+00> : vector<16x96xf32>
    %228 = tpu.matmul %227, %226, %cst_95 {dimension_numbers = #tpu.dot_dimension_numbers<[1], [0], [0], [1], [0, 0, 1, 1], [], []>} : vector<16x32xbf16>, vector<32x96xbf16>, vector<16x96xf32> -> vector<16x96xf32>
    %c1_96 = arith.constant 1 : index
    %c0_97 = arith.constant 0 : index
    %c0_98 = arith.constant 0 : index
    %229 = vector.load %arg8[%c1_96, %c0_97, %c0_98] : memref<2x1x96xf32, #tpu.memory_space<vmem>>, vector<1x1x96xf32>
    %230 = vector.shape_cast %229 : vector<1x1x96xf32> to vector<1x96xf32>
    %231 = vector.broadcast %230 : vector<1x96xf32> to vector<16x96xf32>
    %232 = arith.addf %228, %231 : vector<16x96xf32>
    %233 = vector.extract_strided_slice %232 {offsets = [0, 0], sizes = [16, 32], strides = [1, 1]} : vector<16x96xf32> to vector<16x32xf32>
    %234 = vector.extract_strided_slice %232 {offsets = [0, 32], sizes = [16, 32], strides = [1, 1]} : vector<16x96xf32> to vector<16x32xf32>
    %235 = vector.extract_strided_slice %232 {offsets = [0, 64], sizes = [16, 32], strides = [1, 1]} : vector<16x96xf32> to vector<16x32xf32>
    %236 = vector.extract_strided_slice %7 {offsets = [0, 0, 0], sizes = [1, 1, 32], strides = [1, 1, 1]} : vector<4x1x32xf32> to vector<1x1x32xf32>
    %237 = vector.shape_cast %236 : vector<1x1x32xf32> to vector<1x32xf32>
    %238 = vector.broadcast %237 : vector<1x32xf32> to vector<16x32xf32>
    %239 = arith.mulf %233, %238 : vector<16x32xf32>
    %240 = vector.extract_strided_slice %7 {offsets = [1, 0, 0], sizes = [1, 1, 32], strides = [1, 1, 1]} : vector<4x1x32xf32> to vector<1x1x32xf32>
    %241 = vector.shape_cast %240 : vector<1x1x32xf32> to vector<1x32xf32>
    %242 = vector.broadcast %241 : vector<1x32xf32> to vector<16x32xf32>
    %243 = arith.mulf %233, %242 : vector<16x32xf32>
    %244 = vector.extract_strided_slice %7 {offsets = [2, 0, 0], sizes = [1, 1, 32], strides = [1, 1, 1]} : vector<4x1x32xf32> to vector<1x1x32xf32>
    %245 = vector.shape_cast %244 : vector<1x1x32xf32> to vector<1x32xf32>
    %246 = vector.broadcast %245 : vector<1x32xf32> to vector<16x32xf32>
    %247 = arith.mulf %233, %246 : vector<16x32xf32>
    %248 = vector.extract_strided_slice %7 {offsets = [3, 0, 0], sizes = [1, 1, 32], strides = [1, 1, 1]} : vector<4x1x32xf32> to vector<1x1x32xf32>
    %249 = vector.shape_cast %248 : vector<1x1x32xf32> to vector<1x32xf32>
    %250 = vector.broadcast %249 : vector<1x32xf32> to vector<16x32xf32>
    %251 = arith.mulf %233, %250 : vector<16x32xf32>
    %252 = tpu.concatenate %239, %243, %247, %251 in 0 : vector<16x32xf32>, vector<16x32xf32>, vector<16x32xf32>, vector<16x32xf32> -> vector<64x32xf32>
    %253 = arith.truncf %252 : vector<64x32xf32> to vector<64x32xbf16>
    %254 = arith.truncf %234 : vector<16x32xf32> to vector<16x32xbf16>
    %cst_99 = arith.constant dense<0.000000e+00> : vector<64x16xf32>
    %255 = tpu.matmul %253, %254, %cst_99 {dimension_numbers = #tpu.dot_dimension_numbers<[1], [1], [0], [0], [0, 0, 1, 0], [], []>} : vector<64x32xbf16>, vector<16x32xbf16>, vector<64x16xf32> -> vector<64x16xf32>
    %cst_100 = arith.constant 0.353553385 : f32
    %256 = vector.broadcast %cst_100 : f32 to vector<64x16xf32>
    %257 = arith.mulf %255, %256 : vector<64x16xf32>
    %cst_101 = arith.constant 5.000000e-01 : f32
    %258 = vector.broadcast %cst_101 : f32 to vector<64x16xf32>
    %259 = arith.cmpf ogt, %6, %258 : vector<64x16xf32>
    %cst_102 = arith.constant -1.000000e+30 : f32
    %260 = vector.broadcast %cst_102 : f32 to vector<64x16xf32>
    %261 = arith.select %259, %257, %260 : vector<64x16xi1>, vector<64x16xf32>
    %cst_103 = arith.constant dense<0xFF800000> : vector<64xf32>
    %262 = vector.multi_reduction <maximumf>, %261, %cst_103 [1] : vector<64x16xf32> to vector<64xf32>
    %263 = vector.shape_cast %262 : vector<64xf32> to vector<64x1xf32>
    %264 = vector.broadcast %263 : vector<64x1xf32> to vector<64x16xf32>
    %265 = arith.subf %261, %264 : vector<64x16xf32>
    %266 = math.exp %265 : vector<64x16xf32>
    %cst_104 = arith.constant dense<0.000000e+00> : vector<64xf32>
    %267 = vector.multi_reduction <add>, %266, %cst_104 [1] : vector<64x16xf32> to vector<64xf32>
    %268 = vector.shape_cast %267 : vector<64xf32> to vector<64x1xf32>
    %269 = tpu.reciprocal %268 : vector<64x1xf32> -> vector<64x1xf32>
    %270 = vector.broadcast %269 : vector<64x1xf32> to vector<64x16xf32>
    %271 = arith.mulf %266, %270 : vector<64x16xf32>
    %272 = arith.truncf %271 : vector<64x16xf32> to vector<64x16xbf16>
    %273 = arith.truncf %235 : vector<16x32xf32> to vector<16x32xbf16>
    %cst_105 = arith.constant dense<0.000000e+00> : vector<64x32xf32>
    %274 = tpu.matmul %272, %273, %cst_105 {dimension_numbers = #tpu.dot_dimension_numbers<[1], [0], [0], [1], [0, 0, 1, 1], [], []>} : vector<64x16xbf16>, vector<16x32xbf16>, vector<64x32xf32> -> vector<64x32xf32>
    %275 = vector.extract_strided_slice %274 {offsets = [0, 0], sizes = [16, 32], strides = [1, 1]} : vector<64x32xf32> to vector<16x32xf32>
    %276 = vector.extract_strided_slice %7 {offsets = [0, 0, 0], sizes = [1, 1, 32], strides = [1, 1, 1]} : vector<4x1x32xf32> to vector<1x1x32xf32>
    %277 = vector.shape_cast %276 : vector<1x1x32xf32> to vector<1x32xf32>
    %278 = vector.broadcast %277 : vector<1x32xf32> to vector<16x32xf32>
    %279 = arith.mulf %275, %278 : vector<16x32xf32>
    %280 = vector.extract_strided_slice %274 {offsets = [16, 0], sizes = [16, 32], strides = [1, 1]} : vector<64x32xf32> to vector<16x32xf32>
    %281 = vector.extract_strided_slice %7 {offsets = [1, 0, 0], sizes = [1, 1, 32], strides = [1, 1, 1]} : vector<4x1x32xf32> to vector<1x1x32xf32>
    %282 = vector.shape_cast %281 : vector<1x1x32xf32> to vector<1x32xf32>
    %283 = vector.broadcast %282 : vector<1x32xf32> to vector<16x32xf32>
    %284 = arith.mulf %280, %283 : vector<16x32xf32>
    %285 = arith.addf %279, %284 : vector<16x32xf32>
    %286 = vector.extract_strided_slice %274 {offsets = [32, 0], sizes = [16, 32], strides = [1, 1]} : vector<64x32xf32> to vector<16x32xf32>
    %287 = vector.extract_strided_slice %7 {offsets = [2, 0, 0], sizes = [1, 1, 32], strides = [1, 1, 1]} : vector<4x1x32xf32> to vector<1x1x32xf32>
    %288 = vector.shape_cast %287 : vector<1x1x32xf32> to vector<1x32xf32>
    %289 = vector.broadcast %288 : vector<1x32xf32> to vector<16x32xf32>
    %290 = arith.mulf %286, %289 : vector<16x32xf32>
    %291 = arith.addf %285, %290 : vector<16x32xf32>
    %292 = vector.extract_strided_slice %274 {offsets = [48, 0], sizes = [16, 32], strides = [1, 1]} : vector<64x32xf32> to vector<16x32xf32>
    %293 = vector.extract_strided_slice %7 {offsets = [3, 0, 0], sizes = [1, 1, 32], strides = [1, 1, 1]} : vector<4x1x32xf32> to vector<1x1x32xf32>
    %294 = vector.shape_cast %293 : vector<1x1x32xf32> to vector<1x32xf32>
    %295 = vector.broadcast %294 : vector<1x32xf32> to vector<16x32xf32>
    %296 = arith.mulf %292, %295 : vector<16x32xf32>
    %297 = arith.addf %291, %296 : vector<16x32xf32>
    %c1_106 = arith.constant 1 : index
    %c0_107 = arith.constant 0 : index
    %c0_108 = arith.constant 0 : index
    %298 = vector.load %arg9[%c1_106, %c0_107, %c0_108] : memref<2x32x32xbf16, #tpu.memory_space<vmem>>, vector<1x32x32xbf16>
    %299 = vector.shape_cast %298 : vector<1x32x32xbf16> to vector<32x32xbf16>
    %300 = arith.truncf %297 : vector<16x32xf32> to vector<16x32xbf16>
    %cst_109 = arith.constant dense<0.000000e+00> : vector<16x32xf32>
    %301 = tpu.matmul %300, %299, %cst_109 {dimension_numbers = #tpu.dot_dimension_numbers<[1], [0], [0], [1], [0, 0, 1, 1], [], []>} : vector<16x32xbf16>, vector<32x32xbf16>, vector<16x32xf32> -> vector<16x32xf32>
    %c1_110 = arith.constant 1 : index
    %c0_111 = arith.constant 0 : index
    %c0_112 = arith.constant 0 : index
    %302 = vector.load %arg10[%c1_110, %c0_111, %c0_112] : memref<2x1x32xf32, #tpu.memory_space<vmem>>, vector<1x1x32xf32>
    %303 = vector.shape_cast %302 : vector<1x1x32xf32> to vector<1x32xf32>
    %304 = vector.broadcast %303 : vector<1x32xf32> to vector<16x32xf32>
    %305 = arith.addf %301, %304 : vector<16x32xf32>
    %306 = arith.addf %305, %198 : vector<16x32xf32>
    %c1_113 = arith.constant 1 : index
    %c0_114 = arith.constant 0 : index
    %c0_115 = arith.constant 0 : index
    %307 = vector.load %arg11[%c1_113, %c0_114, %c0_115] : memref<2x1x32xf32, #tpu.memory_space<vmem>>, vector<1x1x32xf32>
    %308 = vector.shape_cast %307 : vector<1x1x32xf32> to vector<1x32xf32>
    %c1_116 = arith.constant 1 : index
    %c0_117 = arith.constant 0 : index
    %c0_118 = arith.constant 0 : index
    %309 = vector.load %arg12[%c1_116, %c0_117, %c0_118] : memref<2x1x32xf32, #tpu.memory_space<vmem>>, vector<1x1x32xf32>
    %310 = vector.shape_cast %309 : vector<1x1x32xf32> to vector<1x32xf32>
    %cst_119 = arith.constant dense<0.000000e+00> : vector<16xf32>
    %311 = vector.multi_reduction <add>, %306, %cst_119 [1] : vector<16x32xf32> to vector<16xf32>
    %312 = vector.shape_cast %311 : vector<16xf32> to vector<16x1xf32>
    %cst_120 = arith.constant 3.200000e+01 : f32
    %313 = vector.broadcast %cst_120 : f32 to vector<16x1xf32>
    %314 = arith.divf %312, %313 : vector<16x1xf32>
    %315 = vector.broadcast %314 : vector<16x1xf32> to vector<16x32xf32>
    %316 = arith.subf %306, %315 : vector<16x32xf32>
    %317 = arith.mulf %316, %316 : vector<16x32xf32>
    %cst_121 = arith.constant dense<0.000000e+00> : vector<16xf32>
    %318 = vector.multi_reduction <add>, %317, %cst_121 [1] : vector<16x32xf32> to vector<16xf32>
    %319 = vector.shape_cast %318 : vector<16xf32> to vector<16x1xf32>
    %cst_122 = arith.constant 3.200000e+01 : f32
    %320 = vector.broadcast %cst_122 : f32 to vector<16x1xf32>
    %321 = arith.divf %319, %320 : vector<16x1xf32>
    %322 = vector.broadcast %314 : vector<16x1xf32> to vector<16x32xf32>
    %323 = arith.subf %306, %322 : vector<16x32xf32>
    %cst_123 = arith.constant 9.99999997E-7 : f32
    %324 = vector.broadcast %cst_123 : f32 to vector<16x1xf32>
    %325 = arith.addf %321, %324 : vector<16x1xf32>
    %326 = math.rsqrt %325 : vector<16x1xf32>
    %327 = vector.broadcast %326 : vector<16x1xf32> to vector<16x32xf32>
    %328 = arith.mulf %323, %327 : vector<16x32xf32>
    %329 = vector.broadcast %308 : vector<1x32xf32> to vector<16x32xf32>
    %330 = arith.mulf %328, %329 : vector<16x32xf32>
    %331 = vector.broadcast %310 : vector<1x32xf32> to vector<16x32xf32>
    %332 = arith.addf %330, %331 : vector<16x32xf32>
    %c1_124 = arith.constant 1 : index
    %c0_125 = arith.constant 0 : index
    %c0_126 = arith.constant 0 : index
    %333 = vector.load %arg13[%c1_124, %c0_125, %c0_126] : memref<2x32x64xbf16, #tpu.memory_space<vmem>>, vector<1x32x64xbf16>
    %334 = vector.shape_cast %333 : vector<1x32x64xbf16> to vector<32x64xbf16>
    %335 = arith.truncf %332 : vector<16x32xf32> to vector<16x32xbf16>
    %cst_127 = arith.constant dense<0.000000e+00> : vector<16x64xf32>
    %336 = tpu.matmul %335, %334, %cst_127 {dimension_numbers = #tpu.dot_dimension_numbers<[1], [0], [0], [1], [0, 0, 1, 1], [], []>} : vector<16x32xbf16>, vector<32x64xbf16>, vector<16x64xf32> -> vector<16x64xf32>
    %c1_128 = arith.constant 1 : index
    %c0_129 = arith.constant 0 : index
    %c0_130 = arith.constant 0 : index
    %337 = vector.load %arg14[%c1_128, %c0_129, %c0_130] : memref<2x1x64xf32, #tpu.memory_space<vmem>>, vector<1x1x64xf32>
    %338 = vector.shape_cast %337 : vector<1x1x64xf32> to vector<1x64xf32>
    %339 = vector.broadcast %338 : vector<1x64xf32> to vector<16x64xf32>
    %340 = arith.addf %336, %339 : vector<16x64xf32>
    %cst_131 = arith.constant 0.707106769 : f32
    %341 = vector.broadcast %cst_131 : f32 to vector<16x64xf32>
    %342 = arith.mulf %340, %341 : vector<16x64xf32>
    %343 = math.absf %342 : vector<16x64xf32>
    %cst_132 = arith.constant 0.327591091 : f32
    %344 = vector.broadcast %cst_132 : f32 to vector<16x64xf32>
    %345 = arith.mulf %344, %343 : vector<16x64xf32>
    %cst_133 = arith.constant 1.000000e+00 : f32
    %346 = vector.broadcast %cst_133 : f32 to vector<16x64xf32>
    %347 = arith.addf %346, %345 : vector<16x64xf32>
    %cst_134 = arith.constant 1.000000e+00 : f32
    %348 = vector.broadcast %cst_134 : f32 to vector<16x64xf32>
    %349 = arith.divf %348, %347 : vector<16x64xf32>
    %cst_135 = arith.constant 1.06140542 : f32
    %350 = vector.broadcast %cst_135 : f32 to vector<16x64xf32>
    %351 = arith.mulf %349, %350 : vector<16x64xf32>
    %cst_136 = arith.constant -1.45315206 : f32
    %352 = vector.broadcast %cst_136 : f32 to vector<16x64xf32>
    %353 = arith.addf %352, %351 : vector<16x64xf32>
    %354 = arith.mulf %349, %353 : vector<16x64xf32>
    %cst_137 = arith.constant 1.42141378 : f32
    %355 = vector.broadcast %cst_137 : f32 to vector<16x64xf32>
    %356 = arith.addf %355, %354 : vector<16x64xf32>
    %357 = arith.mulf %349, %356 : vector<16x64xf32>
    %cst_138 = arith.constant -0.284496725 : f32
    %358 = vector.broadcast %cst_138 : f32 to vector<16x64xf32>
    %359 = arith.addf %358, %357 : vector<16x64xf32>
    %360 = arith.mulf %349, %359 : vector<16x64xf32>
    %cst_139 = arith.constant 0.254829586 : f32
    %361 = vector.broadcast %cst_139 : f32 to vector<16x64xf32>
    %362 = arith.addf %361, %360 : vector<16x64xf32>
    %363 = arith.mulf %349, %362 : vector<16x64xf32>
    %cst_140 = arith.constant 0.000000e+00 : f32
    %364 = vector.broadcast %cst_140 : f32 to vector<16x64xf32>
    %365 = arith.subf %364, %343 : vector<16x64xf32>
    %366 = arith.mulf %365, %343 : vector<16x64xf32>
    %367 = math.exp %366 : vector<16x64xf32>
    %368 = arith.mulf %363, %367 : vector<16x64xf32>
    %cst_141 = arith.constant 1.000000e+00 : f32
    %369 = vector.broadcast %cst_141 : f32 to vector<16x64xf32>
    %370 = arith.subf %369, %368 : vector<16x64xf32>
    %cst_142 = arith.constant 0.000000e+00 : f32
    %371 = vector.broadcast %cst_142 : f32 to vector<16x64xf32>
    %372 = arith.cmpf oge, %342, %371 : vector<16x64xf32>
    %cst_143 = arith.constant 0.000000e+00 : f32
    %373 = vector.broadcast %cst_143 : f32 to vector<16x64xf32>
    %374 = arith.subf %373, %370 : vector<16x64xf32>
    %375 = arith.select %372, %370, %374 : vector<16x64xi1>, vector<16x64xf32>
    %cst_144 = arith.constant 5.000000e-01 : f32
    %376 = vector.broadcast %cst_144 : f32 to vector<16x64xf32>
    %377 = arith.mulf %376, %340 : vector<16x64xf32>
    %cst_145 = arith.constant 1.000000e+00 : f32
    %378 = vector.broadcast %cst_145 : f32 to vector<16x64xf32>
    %379 = arith.addf %378, %375 : vector<16x64xf32>
    %380 = arith.mulf %377, %379 : vector<16x64xf32>
    %c1_146 = arith.constant 1 : index
    %c0_147 = arith.constant 0 : index
    %c0_148 = arith.constant 0 : index
    %381 = vector.load %arg15[%c1_146, %c0_147, %c0_148] : memref<2x64x32xbf16, #tpu.memory_space<vmem>>, vector<1x64x32xbf16>
    %382 = vector.shape_cast %381 : vector<1x64x32xbf16> to vector<64x32xbf16>
    %383 = arith.truncf %380 : vector<16x64xf32> to vector<16x64xbf16>
    %cst_149 = arith.constant dense<0.000000e+00> : vector<16x32xf32>
    %384 = tpu.matmul %383, %382, %cst_149 {dimension_numbers = #tpu.dot_dimension_numbers<[1], [0], [0], [1], [0, 0, 1, 1], [], []>} : vector<16x64xbf16>, vector<64x32xbf16>, vector<16x32xf32> -> vector<16x32xf32>
    %c1_150 = arith.constant 1 : index
    %c0_151 = arith.constant 0 : index
    %c0_152 = arith.constant 0 : index
    %385 = vector.load %arg16[%c1_150, %c0_151, %c0_152] : memref<2x1x32xf32, #tpu.memory_space<vmem>>, vector<1x1x32xf32>
    %386 = vector.shape_cast %385 : vector<1x1x32xf32> to vector<1x32xf32>
    %387 = vector.broadcast %386 : vector<1x32xf32> to vector<16x32xf32>
    %388 = arith.addf %384, %387 : vector<16x32xf32>
    %389 = arith.addf %388, %306 : vector<16x32xf32>
    %c0_153 = arith.constant 0 : index
    %c0_154 = arith.constant 0 : index
    %390 = vector.load %arg17[%c0_153, %c0_154] : memref<1x32xf32, #tpu.memory_space<vmem>>, vector<1x32xf32>
    %c0_155 = arith.constant 0 : index
    %c0_156 = arith.constant 0 : index
    %391 = vector.load %arg18[%c0_155, %c0_156] : memref<1x32xf32, #tpu.memory_space<vmem>>, vector<1x32xf32>
    %cst_157 = arith.constant dense<0.000000e+00> : vector<16xf32>
    %392 = vector.multi_reduction <add>, %389, %cst_157 [1] : vector<16x32xf32> to vector<16xf32>
    %393 = vector.shape_cast %392 : vector<16xf32> to vector<16x1xf32>
    %cst_158 = arith.constant 3.200000e+01 : f32
    %394 = vector.broadcast %cst_158 : f32 to vector<16x1xf32>
    %395 = arith.divf %393, %394 : vector<16x1xf32>
    %396 = vector.broadcast %395 : vector<16x1xf32> to vector<16x32xf32>
    %397 = arith.subf %389, %396 : vector<16x32xf32>
    %398 = arith.mulf %397, %397 : vector<16x32xf32>
    %cst_159 = arith.constant dense<0.000000e+00> : vector<16xf32>
    %399 = vector.multi_reduction <add>, %398, %cst_159 [1] : vector<16x32xf32> to vector<16xf32>
    %400 = vector.shape_cast %399 : vector<16xf32> to vector<16x1xf32>
    %cst_160 = arith.constant 3.200000e+01 : f32
    %401 = vector.broadcast %cst_160 : f32 to vector<16x1xf32>
    %402 = arith.divf %400, %401 : vector<16x1xf32>
    %403 = vector.broadcast %395 : vector<16x1xf32> to vector<16x32xf32>
    %404 = arith.subf %389, %403 : vector<16x32xf32>
    %cst_161 = arith.constant 9.99999997E-7 : f32
    %405 = vector.broadcast %cst_161 : f32 to vector<16x1xf32>
    %406 = arith.addf %402, %405 : vector<16x1xf32>
    %407 = math.rsqrt %406 : vector<16x1xf32>
    %408 = vector.broadcast %407 : vector<16x1xf32> to vector<16x32xf32>
    %409 = arith.mulf %404, %408 : vector<16x32xf32>
    %410 = vector.broadcast %390 : vector<1x32xf32> to vector<16x32xf32>
    %411 = arith.mulf %409, %410 : vector<16x32xf32>
    %412 = vector.broadcast %391 : vector<1x32xf32> to vector<16x32xf32>
    %413 = arith.addf %411, %412 : vector<16x32xf32>
    %c0_162 = arith.constant 0 : index
    %c0_163 = arith.constant 0 : index
    %414 = vector.load %arg19[%c0_162, %c0_163] : memref<32x128xbf16, #tpu.memory_space<vmem>>, vector<32x128xbf16>
    %415 = arith.truncf %413 : vector<16x32xf32> to vector<16x32xbf16>
    %cst_164 = arith.constant dense<0.000000e+00> : vector<16x128xf32>
    %416 = tpu.matmul %415, %414, %cst_164 {dimension_numbers = #tpu.dot_dimension_numbers<[1], [0], [0], [1], [0, 0, 1, 1], [], []>} : vector<16x32xbf16>, vector<32x128xbf16>, vector<16x128xf32> -> vector<16x128xf32>
    %c0_165 = arith.constant 0 : index
    %c0_166 = arith.constant 0 : index
    %417 = vector.load %arg20[%c0_165, %c0_166] : memref<1x128xf32, #tpu.memory_space<vmem>>, vector<1x128xf32>
    %418 = vector.broadcast %417 : vector<1x128xf32> to vector<16x128xf32>
    %419 = arith.addf %416, %418 : vector<16x128xf32>
    %c0_167 = arith.constant 0 : index
    %c0_168 = arith.constant 0 : index
    %420 = vector.load %arg21[%c0_167, %c0_168] : memref<16x128xf32, #tpu.memory_space<vmem>>, vector<16x128xf32>
    tpu.vector_store %arg21[%c0_167, %c0_168], %419 {strides = array<i32>} : memref<16x128xf32, #tpu.memory_space<vmem>>, vector<16x128xf32>,
    return
  }
}

</mosaic_0001>

<bundles_post_ra>
// kernel: vit_forward.1
= control target key start
LH: loop header
LB: loop body
LE: loop exit
PB: predicated region body
PF: predicated region fallthrough
CT: control target
= control target key end

     0   :  { %v2286_v0 = vmov 0   ;;  %vm173_vm0 = vcmask 523264   ;;  %vm232_vm1 = vcmask 261120   ;;  %v2287_v40 = vmov 0.0   ;;  %s2289_s28 = smov 96   ;;  %s2902_s4 = inlined_call_operand.vmem [shape: bf16[192,32], index: 4, kind: input, shape index: {}]   ;;  %s2903_s0 = inlined_call_operand.vmem [shape: f32[16,192], index: 0, kind: input, shape index: {}]   ;;  %s2904_s1 = inlined_call_operand.vmem [shape: f32[16,32], index: 1, kind: input, shape index: {}]   ;;  %s2905_s7 = inlined_call_operand.vmem [shape: bf16[2,32,96], index: 7, kind: input, shape index: {}]   ;;  %s2906_s5 = inlined_call_operand.vmem [shape: f32[2,1,32], index: 5, kind: input, shape index: {}]   ;;  %s2907_s6 = inlined_call_operand.vmem [shape: f32[2,1,32], index: 6, kind: input, shape index: {}]   ;;  %s2908_s8 = inlined_call_operand.vmem [shape: f32[2,1,96], index: 8, kind: input, shape index: {}]   ;;  %s2909_s3 = inlined_call_operand.vmem [shape: f32[4,1,32], index: 3, kind: input, shape index: {}]   ;;  %s2910_s2 = inlined_call_operand.vmem [shape: f32[64,16], index: 2, kind: input, shape index: {}]   ;;  %s2911_s9 = inlined_call_operand.vmem [shape: bf16[2,32,32], index: 9, kind: input, shape index: {}]   ;;  %s2912_s10 = inlined_call_operand.vmem [shape: f32[2,1,32], index: 10, kind: input, shape index: {}]   ;;  %s2913_s13 = inlined_call_operand.vmem [shape: bf16[2,32,64], index: 13, kind: input, shape index: {}]   ;;  %s2914_s11 = inlined_call_operand.vmem [shape: f32[2,1,32], index: 11, kind: input, shape index: {}]   ;;  %s2915_s12 = inlined_call_operand.vmem [shape: f32[2,1,32], index: 12, kind: input, shape index: {}]   ;;  %s2916_s15 = inlined_call_operand.vmem [shape: bf16[2,64,32], index: 15, kind: input, shape index: {}]   ;;  %s2917_s14 = inlined_call_operand.vmem [shape: f32[2,1,64], index: 14, kind: input, shape index: {}]   ;;  %s2918_s16 = inlined_call_operand.vmem [shape: f32[2,1,32], index: 16, kind: input, shape index: {}]   ;;  %s2919_s19 = inlined_call_operand.vmem [shape: bf16[32,128], index: 19, kind: input, shape index: {}]   ;;  %s2920_s17 = inlined_call_operand.vmem [shape: f32[1,32], index: 17, kind: input, shape index: {}]   ;;  %s2921_s18 = inlined_call_operand.vmem [shape: f32[1,32], index: 18, kind: input, shape index: {}]   ;;  %s2922_s20 = inlined_call_operand.vmem [shape: f32[1,128], index: 20, kind: input, shape index: {}]   ;;  %s2923_s21 = inlined_call_operand.vmem [shape: f32[16,128], index: 21, kind: output, shape index: {}]  }
   0x1   :  { %2930 = sst [smem:[#allocation2_spill]] %s2902_s4  ;;  %177 = vmatprep.subr.bf16.mxu0 %v2286_v0  ;;  %2021 = vmatprep.subr.bf16.mxu1 %v2287_v40  ;;  %vm2288_vm2 = vmmov 0   ;;  %v1874_v59 = vld [vmem:[%s2908_s8] ss:$0 sm:$0xff]  ;;  %v2494_v60 = vld [vmem:[%s2909_s3 + $0x1] ss:$0 sm:$0xff] }
   0x2   :  { %2931 = sst [smem:[#allocation3_spill]] %s2903_s0  ;;  %s2936_s26 = sld [smem:[#allocation2_spill]]  ;;  %2025 = vmatprep.mubr.msk.bf16.mxu1 %vm2288_vm2, %v2287_v40  ;;  %vm488_vm4 = vcmask 130048  }
   0x3   :  { %2932 = sst [smem:[#allocation4_spill]] %s2904_s1  ;;  %s2937_s22 = sld [smem:[#allocation3_spill]] }
   0x4   :  { %2933 = sst [smem:[#allocation5_spill]] %s2905_s7  ;;  %s2938_s30 = sld [smem:[#allocation4_spill]] }
   0x5   :  { %2934 = sst [smem:[#allocation6_spill]] %s2906_s5  ;;  %s2939_s0 = sld [smem:[#allocation5_spill]] }
   0x6   :  { %2935 = sst [smem:[#allocation7_spill]] %s2907_s6  ;;  %s2940_s7 = sld [smem:[#allocation6_spill]] }
   0x7   :  { %s2941_s4 = sld [smem:[#allocation7_spill]] }
   0x8   :  { %v2148_v1 = vld [vmem:[%s2936_s26] sm:$0xff]   ;;  %v2149_v2 = vld [vmem:[%s2936_s26 + $0x8] sm:$0xff]   ;;  %v2150_v3 = vld [vmem:[%s2936_s26 + $0x10] sm:$0xff]  }
   0x9   :  { %178 = vmatpush1.bf16.msra.mxu0 %v2148_v1  ;;  %v2151_v4 = vld [vmem:[%s2936_s26 + $0x18] sm:$0xff]   ;;  %v70_v5 = vld [vmem:[%s2937_s22 + $0x8] sm:$0xff]  ;;  %v2152_v8 = vld [vmem:[%s2936_s26 + $0x20] sm:$0xff]  }
   0xa   :  { %179 = vmatprep.subr.bf16.mxu0 %v2286_v0  ;;  %v72_v6 = vld [vmem:[%s2937_s22 + $0x18] sm:$0xff]  ;;  %v2153_v9 = vld [vmem:[%s2936_s26 + $0x28] sm:$0xff]   ;;  %v2154_v10 = vld [vmem:[%s2936_s26 + $0x30] sm:$0xff]  }
   0xb   :  { %v98_v7 = vpack.c.bf16 %v72_v6, %v70_v5  ;;  %v2155_v11 = vld [vmem:[%s2936_s26 + $0x38] sm:$0xff]   ;;  %v2156_v12 = vld [vmem:[%s2936_s26 + $0x40] sm:$0xff]   ;;  %v2157_v13 = vld [vmem:[%s2936_s26 + $0x48] sm:$0xff]  }
   0xc   :  { %v2158_v14 = vld [vmem:[%s2936_s26 + $0x50] sm:$0xff]   ;;  %v2159_v15 = vld [vmem:[%s2936_s26 + $0x58] sm:$0xff]   ;;  %v69_v16 = vld [vmem:[%s2937_s22] sm:$0xff] }
   0xd   :  { %180 = vmatpush1.bf16.msra.mxu0 %v2149_v2  ;;  %1871 = vmatprep.mubr.msk.bf16.mxu0 %vm173_vm0, %v98_v7  ;;  %v71_v17 = vld [vmem:[%s2937_s22 + $0x10] sm:$0xff]  ;;  %v99_v19 = vld [vmem:[%s2938_s30] sm:$0xff]  ;;  %v100_v21 = vld [vmem:[%s2938_s30 + $0x8] sm:$0xff] }
   0xe   :  { %181 = vmatprep.subr.bf16.mxu0 %v2286_v0  ;;  %v97_v18 = vpack.c.bf16 %v71_v17, %v69_v16  ;;  %v2160_v39 = vld [vmem:[%s2939_s0] sm:$0xff]   ;;  %v2161_v41 = vld [vmem:[%s2939_s0 + $0x8] sm:$0xff]  }
   0xf   :  { %2022 = vmatpush3.bf16.msra.mxu1 %v2160_v39  ;;  %v1872_v50 = vld [vmem:[%s2940_s7] ss:$0 sm:$0xff]  ;;  %v2504_v1 = vld [vmem:[%s2909_s3 + $0x2] ss:$0 sm:$0xff]  ;;  %v2509_v5 = vld [vmem:[%s2909_s3 + $0x3] ss:$0 sm:$0xff] }
  0x10   :  { %2023 = vmatprep.subr.bf16.mxu1 %v2287_v40  ;;  %v1873_v54 = vld [vmem:[%s2941_s4] ss:$0 sm:$0xff] }
  0x11   :  { %182 = vmatpush1.bf16.msra.mxu0 %v2150_v3 }
  0x12   :  { %183 = vmatprep.subr.bf16.mxu0 %v2286_v0 }
  0x13   :  { %2024 = vmatpush3.bf16.msra.mxu1 %v2161_v41 }
  0x15   :  { %184 = vmatpush1.bf16.msra.mxu0 %v2151_v4 }
  0x16   :  { %185 = vmatprep.subr.bf16.mxu0 %v2286_v0 }
  0x19   :  { %186 = vmatpush1.bf16.msra.mxu0 %v2152_v8 }
  0x1a   :  { %187 = vmatprep.subr.bf16.mxu0 %v2286_v0 }
  0x1d   :  { %188 = vmatpush1.bf16.msra.mxu0 %v2153_v9 }
  0x1e   :  { %189 = vmatprep.subr.bf16.mxu0 %v2286_v0 }
  0x21   :  { %190 = vmatpush1.bf16.msra.mxu0 %v2154_v10 }
  0x22   :  { %191 = vmatprep.subr.bf16.mxu0 %v2286_v0 }
  0x25   :  { %192 = vmatpush1.bf16.msra.mxu0 %v2155_v11 }
  0x26   :  { %193 = vmatprep.subr.bf16.mxu0 %v2286_v0 }
  0x29   :  { %194 = vmatpush1.bf16.msra.mxu0 %v2156_v12 }
  0x2a   :  { %195 = vmatprep.subr.bf16.mxu0 %v2286_v0 }
  0x2d   :  { %196 = vmatpush1.bf16.msra.mxu0 %v2157_v13 }
  0x2e   :  { %197 = vmatprep.subr.bf16.mxu0 %v2286_v0 }
  0x31   :  { %198 = vmatpush1.bf16.msra.mxu0 %v2158_v14 }
  0x32   :  { %199 = vmatprep.subr.bf16.mxu0 %v2286_v0  ;;  %v2499_v0 = vld [vmem:[%s2909_s3] ss:$0 sm:$0xff] }
  0x35   :  { %200 = vmatpush1.bf16.msra.mxu0 %v2159_v15 }
  0x36   :  { %2057 = vmatprep.subr.bf16.mxu0 %v2287_v40 }
  0x38   :  { %210 = vmatmul.mubr.bf16.vlgmr.msra.gmra.mrb[0].mxu0 %v97_v18 }
  0x39   :  { %2061 = vmatprep.mubr.msk.bf16.mxu0 %vm2288_vm2, %v2287_v40 }
 0x10b   :  { %v211_v20 = vpop.f32.mrb[0].mxu0 }
 0x10c   :  { %v2456_v22 = vadd.f32 %v211_v20, %v99_v19  ;;  %v213_v23 = vpop.f32.mrb[1].mxu0 }
 0x10d   :  { %v214_v24 = vpop.f32.mrb[2].mxu0  ;;  %v2537_v23 = vld [vmem:[%s2910_s2] sm:$0xff] }
 0x10e   :  { %v2458_v25 = vadd.f32 %v214_v24, %v100_v21  ;;  %v216_v26 = vpop.f32.mrb[3].mxu0  ;;  %v233_v27 = vsel %vm232_vm1, %v2456_v22, 0.0  ;;  %v2532_v21 = vld [vmem:[%s2910_s2 + $0x10] sm:$0xff]  ;;  %vm472_vm5 = vcmp.gt.f32.partialorder %v2537_v23, 0.5 }
 0x10f   :  { %234 = vadd.xlane.f32.xlu0 %v233_v27  ;;  %vm474_vm3 = vcmp.gt.f32.partialorder %v2532_v21, 0.5 }
 0x110   :  { %v236_v28 = vsel %vm232_vm1, %v2458_v25, 0.0 }
 0x113   :  { %237 = vadd.xlane.f32.xlu0 %v236_v28 }
 0x19c   :  { %v235_v29 = vpop.xlane.xlu0 %234 }
 0x19d   :  { %v240_v30 = vmul.f32 0.03125, %v235_v29 }
 0x19f   :  { %v242_v31 = vsub.f32 %v2456_v22, %v240_v30 }
 0x1a0   :  { %v238_v32 = vpop.xlane.xlu0 %237 }
 0x1a1   :  { %v241_v33 = vmul.f32 0.03125, %v238_v32  ;;  %v244_v34 = vmul.f32 %v242_v31, %v242_v31  ;;  %v2546_v32 = vld [vmem:[%s2910_s2 + $0x18] sm:$0xff] }
 0x1a2   :  { %vm475_vm6 = vcmp.gt.f32.partialorder %v2546_v32, 0.5 }
 0x1a3   :  { %v243_v35 = vsub.f32 %v2458_v25, %v241_v33  ;;  %v246_v36 = vsel %vm232_vm1, %v244_v34, 0.0 }
 0x1a4   :  { %247 = vadd.xlane.f32.xlu1 %v246_v36  ;;  %v2554_v36 = vld [vmem:[%s2910_s2 + $0x30] sm:$0xff] }
 0x1a5   :  { %v245_v37 = vmul.f32 %v243_v35, %v243_v35  ;;  %vm478_vm7 = vcmp.gt.f32.partialorder %v2554_v36, 0.5 }
 0x1a7   :  { %v249_v38 = vsel %vm232_vm1, %v245_v37, 0.0  ;;  %v2560_v37 = vld [vmem:[%s2910_s2 + $0x8] sm:$0xff] }
 0x1a8   :  { %250 = vadd.xlane.f32.xlu1 %v249_v38  ;;  %vm473_vm8 = vcmp.gt.f32.partialorder %v2560_v37, 0.5 }
 0x231   :  { %v248_v42 = vpop.xlane.xlu1 %247 }
 0x232   :  { %v252_v43 = vmul.f32 0.03125, %v248_v42 }
 0x234   :  { %v254_v44 = vadd.f32 1e-06, %v252_v43 }
 0x235   :  { %v251_v45 = vpop.xlane.xlu1 %250 }
 0x236   :  { %2182 = vrsqrt.f32 %v254_v44  ;;  %v253_v46 = vmul.f32 0.03125, %v251_v45 }
 0x238   :  { %v255_v47 = vadd.f32 1e-06, %v253_v46 }
 0x23a   :  { %2184 = vrsqrt.f32 %v255_v47 }
 0x240   :  { %v2183_v48 = vpop.eup %2182 }
 0x241   :  { %v258_v49 = vmul.f32 %v2183_v48, %v242_v31  ;;  %v2572_v48 = vld [vmem:[%s2910_s2 + $0x20] sm:$0xff] }
 0x242   :  { %vm476_vm9 = vcmp.gt.f32.partialorder %v2572_v48, 0.5 }
 0x243   :  { %v266_v53 = vmul.f32 %v1872_v50, %v258_v49 }
 0x244   :  { %v2185_v51 = vpop.eup %2184 }
 0x245   :  { %v259_v52 = vmul.f32 %v2185_v51, %v243_v35  ;;  %v274_v56 = vadd.f32 %v1873_v54, %v266_v53  ;;  %v2582_v53 = vld [vmem:[%s2910_s2 + $0x28] sm:$0xff] }
 0x246   :  { %vm477_vm10 = vcmp.gt.f32.partialorder %v2582_v53, 0.5 }
 0x247   :  { %v267_v55 = vmul.f32 %v1872_v50, %v259_v52 }
 0x249   :  { %v275_v57 = vadd.f32 %v1873_v54, %v267_v55 }
 0x24b   :  { %v280_v58 = vpack.c.bf16 %v275_v57, %v274_v56  ;;  %v2591_v57 = vld [vmem:[%s2910_s2 + $0x38] sm:$0xff]  ;;  %s2290_s2 = smov 64  }
 0x24c   :  { %vm479_vm11 = vcmp.gt.f32.partialorder %v2591_v57, 0.5 }
 0x24d   :  { %2026 = vmatmul.mubr.msk.bf16.vlgmr.msra.gmra.mrb[0].mxu1 %vm232_vm1, %v280_v58 }
 0x320   :  { %v337_v61 = vpop.f32.mrb[0].mxu1 }
 0x321   :  { %v338_v62 = vadd.f32 %v1874_v59, %v337_v61  ;;  %v2027_v63 = vpop.f32.mrb[1].mxu1 }
 0x322   :  { %v340_v2 = vpop.f32.mrb[2].mxu1 }
 0x323   :  { %v341_v3 = vadd.f32 %v1874_v59, %v340_v2  ;;  %v2028_v4 = vpop.f32.mrb[3].mxu1  ;;  %v358_v6 = vmul.f32 %v2494_v60, %v338_v62  ;;  %v350_v7 = vmul.f32 %v2499_v0, %v338_v62  ;;  %v366_v8 = vmul.f32 %v2504_v1, %v338_v62 }
 0x324   :  { %v374_v13 = vmul.f32 %v2509_v5, %v338_v62 }
 0x325   :  { %v359_v9 = vmul.f32 %v2494_v60, %v341_v3  ;;  %v2515_v10 = vpack.c.bf16 %v341_v3, %v338_v62  ;;  %v351_v11 = vmul.f32 %v2499_v0, %v341_v3  ;;  %v367_v12 = vmul.f32 %v2504_v1, %v341_v3 }
 0x326   :  { %v375_v14 = vmul.f32 %v2509_v5, %v341_v3 }
 0x327   :  { %382 = vrot.lane.b32.xlu0 %v2515_v10, %s2289_s28  ;;  %v376_v15 = vpack.c.bf16 %v351_v11, %v350_v7  ;;  %v377_v16 = vpack.c.bf16 %v359_v9, %v358_v6  ;;  %v378_v17 = vpack.c.bf16 %v367_v12, %v366_v8 }
 0x328   :  { %v379_v18 = vpack.c.bf16 %v375_v14, %v374_v13 }
 0x329   :  { %2031 = vmatprep.mubr.msk.bf16.mxu1 %vm232_vm1, %v376_v15 }
 0x399   :  { %v383_v19 = vpop.permute.xlu0 %382 }
 0x39a   :  { %v397_v20 = vsel %vm232_vm1, %v383_v19, 0  ;;  %2141 = vmatprep.subr.msk.bf16.mxu1 %vm232_vm1, %v383_v19 }
 0x39b   :  { %2030 = vmatpush3.bf16.xpose.msra.mxu1 %v397_v20 }
 0x3a2   :  { %2032 = vmatmul.mubr.msk.bf16.vlgmr.msra.gmra.mrb[4].mxu1 %vm232_vm1, %v377_v16 }
 0x3a3   :  { %2035 = vmatprep.mubr.msk.bf16.mxu1 %vm232_vm1, %v378_v17 }
 0x3aa   :  { %2036 = vmatmul.mubr.msk.bf16.gmra.mrb[8].mxu1 %vm232_vm1, %v379_v18 }
 0x475   :  { %v2033_v24 = vpop.f32.mrb[4].mxu1 }
 0x476   :  { %v466_v26 = vmul.f32 0.35355338, %v2033_v24  ;;  %v433_v27 = vpop.f32.mrb[5].mxu1 }
 0x477   :  { %v464_v28 = vmul.f32 0.35355338, %v433_v27  ;;  %v2034_v29 = vpop.f32.mrb[6].mxu1 }
 0x478   :  { %v436_v30 = vpop.f32.mrb[7].mxu1  ;;  %v482_v31 = vsel %vm474_vm3, %v466_v26, -1e+30  ;;  %v467_v34 = vmul.f32 0.35355338, %v2034_v29 }
 0x479   :  { %v495_v33 = vsel %vm488_vm4, %v482_v31, -inf  ;;  %v480_v35 = vsel %vm472_vm5, %v464_v28, -1e+30  ;;  %v465_v38 = vmul.f32 0.35355338, %v436_v30 }
 0x47a   :  { %496 = vmax.xlane.f32.xlu1 %v495_v33  ;;  %v489_v41 = vsel %vm488_vm4, %v480_v35, -inf  ;;  %v483_v44 = vsel %vm475_vm6, %v467_v34, -1e+30 }
 0x47b   :  { %v498_v49 = vsel %vm488_vm4, %v483_v44, -inf  ;;  %v481_v52 = vsel %vm473_vm8, %v465_v38, -1e+30 }
 0x47c   :  { %v492_v54 = vsel %vm488_vm4, %v481_v52, -inf }
 0x47d   :  { %v2037_v39 = vpop.f32.mrb[8].mxu1 }
 0x47e   :  { %v470_v42 = vmul.f32 0.35355338, %v2037_v39  ;;  %490 = vmax.xlane.f32.xlu1 %v489_v41  ;;  %v449_v43 = vpop.f32.mrb[9].mxu1 }
 0x47f   :  { %v2038_v45 = vpop.f32.mrb[10].mxu1  ;;  %v468_v51 = vmul.f32 0.35355338, %v449_v43 }
 0x480   :  { %v452_v46 = vpop.f32.mrb[11].mxu1  ;;  %v486_v47 = vsel %vm478_vm7, %v470_v42, -1e+30  ;;  %v471_v59 = vmul.f32 0.35355338, %v2038_v45 }
 0x481   :  { %v507_v50 = vsel %vm488_vm4, %v486_v47, -inf  ;;  %v469_v55 = vmul.f32 0.35355338, %v452_v46  ;;  %v484_v56 = vsel %vm476_vm9, %v468_v51, -1e+30 }
 0x482   :  { %499 = vmax.xlane.f32.xlu1 %v498_v49  ;;  %508 = vmax.xlane.f32.xlu0 %v507_v50  ;;  %v501_v58 = vsel %vm488_vm4, %v484_v56, -inf  ;;  %v487_v63 = vsel %vm479_vm11, %v471_v59, -1e+30 }
 0x483   :  { %v485_v61 = vsel %vm477_vm10, %v469_v55, -1e+30  ;;  %v510_v2 = vsel %vm488_vm4, %v487_v63, -inf }
 0x484   :  { %v504_v62 = vsel %vm488_vm4, %v485_v61, -inf }
 0x486   :  { %493 = vmax.xlane.f32.xlu1 %v492_v54 }
 0x48a   :  { %502 = vmax.xlane.f32.xlu1 %v501_v58 }
 0x48e   :  { %505 = vmax.xlane.f32.xlu1 %v504_v62 }
 0x492   :  { %511 = vmax.xlane.f32.xlu1 %v510_v2 }
 0x507   :  { %v497_v3 = vpop.xlane.xlu1 %496 }
 0x508   :  { %v515_v4 = vsub.f32 %v482_v31, %v497_v3 }
 0x50a   :  { %v525_v6 = vmul.f32 1.442695, %v515_v4 }
 0x50b   :  { %v491_v7 = vpop.xlane.xlu1 %490 }
 0x50c   :  { %2186 = vpow2.f32 %v525_v6  ;;  %v513_v8 = vsub.f32 %v480_v35, %v491_v7 }
 0x50e   :  { %v521_v9 = vmul.f32 1.442695, %v513_v8 }
 0x50f   :  { %v500_v11 = vpop.xlane.xlu1 %499  ;;  %v509_v12 = vpop.xlane.xlu0 %508 }
 0x510   :  { %2188 = vpow2.f32 %v521_v9  ;;  %v516_v13 = vsub.f32 %v483_v44, %v500_v11  ;;  %v519_v15 = vsub.f32 %v486_v47, %v509_v12 }
 0x512   :  { %v527_v14 = vmul.f32 1.442695, %v516_v13  ;;  %v533_v19 = vmul.f32 1.442695, %v519_v15 }
 0x513   :  { %v494_v16 = vpop.xlane.xlu1 %493 }
 0x514   :  { %2190 = vpow2.f32 %v527_v14  ;;  %v514_v17 = vsub.f32 %v481_v52, %v494_v16 }
 0x516   :  { %v2601_v18 = vpop.eup %2186  ;;  %v523_v20 = vmul.f32 1.442695, %v514_v17 }
 0x517   :  { %v503_v24 = vpop.xlane.xlu1 %502  ;;  %v543_v26 = vsel %vm488_vm4, %v2601_v18, 0.0 }
 0x518   :  { %2192 = vpow2.f32 %v523_v20  ;;  %v517_v27 = vsub.f32 %v484_v56, %v503_v24  ;;  %544 = vadd.xlane.f32.xlu1 %v543_v26 }
 0x519   :  { %2194 = vpow2.f32 %v533_v19 }
 0x51a   :  { %v2189_v28 = vpop.eup %2188  ;;  %v529_v29 = vmul.f32 1.442695, %v517_v27 }
 0x51b   :  { %v506_v30 = vpop.xlane.xlu1 %505  ;;  %v537_v31 = vsel %vm488_vm4, %v2189_v28, 0.0 }
 0x51c   :  { %v518_v33 = vsub.f32 %v485_v61, %v506_v30  ;;  %538 = vadd.xlane.f32.xlu1 %v537_v31  ;;  %2196 = vpow2.f32 %v529_v29  ;;  %v2163_v30 = vld [vmem:[%s2911_s9 + $0x8] sm:$0xff]  }
 0x51e   :  { %v2191_v34 = vpop.eup %2190  ;;  %v531_v35 = vmul.f32 1.442695, %v518_v33 }
 0x51f   :  { %v512_v38 = vpop.xlane.xlu1 %511  ;;  %v546_v39 = vsel %vm488_vm4, %v2191_v34, 0.0 }
 0x520   :  { %v520_v41 = vsub.f32 %v487_v63, %v512_v38  ;;  %547 = vadd.xlane.f32.xlu1 %v546_v39  ;;  %2198 = vpow2.f32 %v531_v35 }
 0x522   :  { %v2193_v42 = vpop.eup %2192  ;;  %v535_v43 = vmul.f32 1.442695, %v520_v41 }
 0x523   :  { %v540_v44 = vsel %vm488_vm4, %v2193_v42, 0.0  ;;  %v2195_v45 = vpop.eup %2194 }
 0x524   :  { %2200 = vpow2.f32 %v535_v43  ;;  %541 = vadd.xlane.f32.xlu1 %v540_v44  ;;  %v555_v46 = vsel %vm488_vm4, %v2195_v45, 0.0 }
 0x526   :  { %v2197_v47 = vpop.eup %2196 }
 0x527   :  { %v549_v49 = vsel %vm488_vm4, %v2197_v47, 0.0 }
 0x528   :  { %556 = vadd.xlane.f32.xlu1 %v555_v46 }
 0x52a   :  { %v2199_v50 = vpop.eup %2198 }
 0x52b   :  { %v552_v52 = vsel %vm488_vm4, %v2199_v50, 0.0 }
 0x52c   :  { %550 = vadd.xlane.f32.xlu1 %v549_v49 }
 0x52e   :  { %v2201_v51 = vpop.eup %2200 }
 0x52f   :  { %v558_v54 = vsel %vm488_vm4, %v2201_v51, 0.0 }
 0x530   :  { %553 = vadd.xlane.f32.xlu1 %v552_v52  ;;  %559 = vadd.xlane.f32.xlu0 %v558_v54 }
 0x541   :  { %581 = vrot.lane.b32.xlu1 %v2515_v10, %s2290_s2 }
 0x5a5   :  { %v545_v55 = vpop.xlane.xlu1 %544 }
 0x5a9   :  { %v539_v56 = vpop.xlane.xlu1 %538 }
 0x5aa   :  { %2202 = vrcp.f32 %v539_v56 }
 0x5ad   :  { %v548_v58 = vpop.xlane.xlu1 %547 }
 0x5b1   :  { %v542_v59 = vpop.xlane.xlu1 %541 }
 0x5b2   :  { %2204 = vrcp.f32 %v542_v59 }
 0x5b3   :  { %2206 = vrcp.f32 %v548_v58 }
 0x5b4   :  { %2208 = vrcp.f32 %v545_v55  ;;  %v2203_v63 = vpop.eup %2202 }
 0x5b5   :  { %v557_v61 = vpop.xlane.xlu1 %556  ;;  %v569_v7 = vmul.f32 %v2203_v63, %v2189_v28 }
 0x5b6   :  { %2210 = vrcp.f32 %v557_v61 }
 0x5b9   :  { %v551_v62 = vpop.xlane.xlu1 %550 }
 0x5ba   :  { %2212 = vrcp.f32 %v551_v62  ;;  %v1890_v62 = vld [vmem:[%s2912_s10] ss:$0 sm:$0xff] }
 0x5bc   :  { %v2205_v2 = vpop.eup %2204 }
 0x5bd   :  { %v2207_v3 = vpop.eup %2206  ;;  %v560_v4 = vpop.xlane.xlu0 %559  ;;  %v570_v8 = vmul.f32 %v2205_v2, %v2193_v42 }
 0x5be   :  { %v554_v6 = vpop.xlane.xlu1 %553  ;;  %2214 = vrcp.f32 %v560_v4  ;;  %v2209_v10 = vpop.eup %2208  ;;  %v572_v11 = vmul.f32 %v2207_v3, %v2191_v34 }
 0x5bf   :  { %2216 = vrcp.f32 %v554_v6  ;;  %v577_v9 = vpack.c.bf16 %v570_v8, %v569_v7  ;;  %v571_v13 = vmul.f32 %v2209_v10, %v2601_v18  ;;  %v2162_v18 = vld [vmem:[%s2911_s9] sm:$0xff]  }
 0x5c0   :  { %v2211_v15 = vpop.eup %2210 }
 0x5c1   :  { %2041 = vmatprep.mubr.msk.bf16.mxu1 %vm488_vm4, %v577_v9  ;;  %v578_v14 = vpack.c.bf16 %v572_v11, %v571_v13  ;;  %v575_v20 = vmul.f32 %v2211_v15, %v2195_v45 }
 0x5c2   :  { %v582_v12 = vpop.permute.xlu1 %581 }
 0x5c3   :  { %2039 = vmatprep.subr.bf16.mxu1 %v582_v12 }
 0x5c4   :  { %2040 = vmatpush3.bf16.msra.mxu1 %v582_v12  ;;  %v2213_v16 = vpop.eup %2212 }
 0x5c5   :  { %2049 = vmatprep.subr.bf16.mxu1 %v2287_v40  ;;  %v573_v26 = vmul.f32 %v2213_v16, %v2197_v47 }
 0x5c7   :  { %2042 = vmatmul.mubr.msk.bf16.vlgmr.msra.gmra.mrb[12].mxu1 %vm488_vm4, %v578_v14 }
 0x5c8   :  { %v2215_v17 = vpop.eup %2214  ;;  %2050 = vmatpush3.bf16.msra.mxu1 %v2162_v18 }
 0x5c9   :  { %v2217_v19 = vpop.eup %2216  ;;  %v576_v24 = vmul.f32 %v2215_v17, %v2201_v51  ;;  %2051 = vmatprep.subr.bf16.mxu1 %v2287_v40 }
 0x5ca   :  { %v574_v27 = vmul.f32 %v2217_v19, %v2199_v50 }
 0x5cb   :  { %v580_v28 = vpack.c.bf16 %v576_v24, %v575_v20  ;;  %v2164_v24 = vld [vmem:[%s2913_s13] sm:$0xff]  }
 0x5cc   :  { %v579_v29 = vpack.c.bf16 %v574_v27, %v573_v26  ;;  %2052 = vmatpush3.bf16.msra.mxu1 %v2163_v30  ;;  %2058 = vmatpush3.bf16.msra.mxu0 %v2164_v24  ;;  %v2165_v26 = vld [vmem:[%s2913_s13 + $0x8] sm:$0xff]  }
 0x5cd   :  { %2065 = vmatprep.subr.bf16.mxu1 %v2287_v40  ;;  %2059 = vmatprep.subr.bf16.mxu0 %v2287_v40 }
 0x5ce   :  { %2045 = vmatprep.mubr.msk.bf16.mxu1 %vm488_vm4, %v579_v29 }
 0x5cf   :  { %2046 = vmatmul.mubr.msk.bf16.gmra.mrb[16].mxu1 %vm488_vm4, %v580_v28 }
 0x5d0   :  { %2053 = vmatprep.mubr.msk.bf16.mxu1 %vm2288_vm2, %v2287_v40  ;;  %2060 = vmatpush3.bf16.msra.mxu0 %v2165_v26 }
 0x5d1   :  { %2077 = vmatprep.subr.bf16.mxu0 %v2287_v40 }
 0x69a   :  { %v2043_v31 = vpop.f32.mrb[12].mxu1 }
 0x69b   :  { %v663_v33 = vmul.f32 %v2043_v31, %v2494_v60  ;;  %v630_v34 = vpop.f32.mrb[13].mxu1 }
 0x69c   :  { %v661_v35 = vmul.f32 %v2499_v0, %v630_v34  ;;  %v2044_v38 = vpop.f32.mrb[14].mxu1 }
 0x69d   :  { %v664_v39 = vmul.f32 %v2044_v38, %v2494_v60  ;;  %v633_v41 = vpop.f32.mrb[15].mxu1 }
 0x69e   :  { %v665_v42 = vadd.f32 %v663_v33, %v661_v35  ;;  %v662_v43 = vmul.f32 %v2499_v0, %v633_v41  ;;  %v1894_v35 = vld [vmem:[%s2914_s11] ss:$0 sm:$0xff] }
 0x6a0   :  { %v666_v44 = vadd.f32 %v664_v39, %v662_v43 }
 0x6a2   :  { %v2047_v45 = vpop.f32.mrb[16].mxu1 }
 0x6a3   :  { %v646_v46 = vpop.f32.mrb[17].mxu1  ;;  %v671_v51 = vmul.f32 %v2047_v45, %v2509_v5 }
 0x6a4   :  { %v667_v47 = vmul.f32 %v2504_v1, %v646_v46  ;;  %v2048_v49 = vpop.f32.mrb[18].mxu1 }
 0x6a5   :  { %v649_v50 = vpop.f32.mrb[19].mxu1  ;;  %v672_v56 = vmul.f32 %v2048_v49, %v2509_v5  ;;  %v2167_v49 = vld [vmem:[%s2916_s15 + $0x8] sm:$0xff]  }
 0x6a6   :  { %v669_v52 = vadd.f32 %v667_v47, %v665_v42  ;;  %v668_v54 = vmul.f32 %v2504_v1, %v649_v50  ;;  %v1895_v42 = vld [vmem:[%s2915_s12] ss:$0 sm:$0xff]  ;;  %v2168_v50 = vld [vmem:[%s2916_s15 + $0x10] sm:$0xff]  }
 0x6a7   :  { %v2166_v47 = vld [vmem:[%s2916_s15] sm:$0xff]  }
 0x6a8   :  { %v673_v55 = vadd.f32 %v671_v51, %v669_v52  ;;  %v670_v58 = vadd.f32 %v668_v54, %v666_v44  ;;  %v2169_v51 = vld [vmem:[%s2916_s15 + $0x18] sm:$0xff]   ;;  %v1896_v52 = vld [vmem:[%s2917_s14] ss:$0 sm:$0xff] }
 0x6aa   :  { %v674_v59 = vadd.f32 %v672_v56, %v670_v58 }
 0x6ac   :  { %v679_v61 = vpack.c.bf16 %v674_v59, %v673_v55 }
 0x6ae   :  { %2054 = vmatmul.mubr.msk.bf16.vlgmr.msra.gmra.mrb[20].mxu1 %vm232_vm1, %v679_v61 }
 0x6af   :  { %2073 = vmatprep.mubr.msk.bf16.mxu1 %vm2288_vm2, %v2287_v40  ;;  %2066 = vmatpush3.bf16.msra.mxu1 %v2166_v47 }
 0x6b0   :  { %2067 = vmatprep.subr.bf16.mxu1 %v2287_v40 }
 0x6b3   :  { %2068 = vmatpush3.bf16.msra.mxu1 %v2167_v49 }
 0x6b4   :  { %2069 = vmatprep.subr.bf16.mxu1 %v2287_v40 }
 0x6b7   :  { %2070 = vmatpush3.bf16.msra.mxu1 %v2168_v50 }
 0x6b8   :  { %2071 = vmatprep.subr.bf16.mxu1 %v2287_v40 }
 0x6bb   :  { %2072 = vmatpush3.bf16.msra.mxu1 %v2169_v51 }
 0x781   :  { %v736_v63 = vpop.f32.mrb[20].mxu1 }
 0x782   :  { %v737_v2 = vadd.f32 %v1890_v62, %v736_v63  ;;  %v2055_v3 = vpop.f32.mrb[21].mxu1 }
 0x783   :  { %v739_v4 = vpop.f32.mrb[22].mxu1 }
 0x784   :  { %v2645_v6 = vadd.f32 %v737_v2, %v2456_v22  ;;  %v740_v7 = vadd.f32 %v1890_v62, %v739_v4  ;;  %v2056_v8 = vpop.f32.mrb[23].mxu1 }
 0x786   :  { %v2648_v10 = vadd.f32 %v740_v7, %v2458_v25  ;;  %v747_v9 = vsel %vm232_vm1, %v2645_v6, 0.0 }
 0x787   :  { %748 = vadd.xlane.f32.xlu0 %v747_v9 }
 0x788   :  { %v750_v11 = vsel %vm232_vm1, %v2648_v10, 0.0 }
 0x78b   :  { %751 = vadd.xlane.f32.xlu0 %v750_v11 }
 0x814   :  { %v749_v12 = vpop.xlane.xlu0 %748 }
 0x815   :  { %v753_v13 = vmul.f32 0.03125, %v749_v12 }
 0x817   :  { %v755_v14 = vsub.f32 %v2645_v6, %v753_v13 }
 0x818   :  { %v752_v15 = vpop.xlane.xlu0 %751 }
 0x819   :  { %v754_v22 = vmul.f32 0.03125, %v752_v15  ;;  %v757_v16 = vmul.f32 %v755_v14, %v755_v14 }
 0x81b   :  { %v756_v17 = vsub.f32 %v2648_v10, %v754_v22  ;;  %v759_v25 = vsel %vm232_vm1, %v757_v16, 0.0 }
 0x81c   :  { %760 = vadd.xlane.f32.xlu0 %v759_v25 }
 0x81d   :  { %v758_v19 = vmul.f32 %v756_v17, %v756_v17 }
 0x81f   :  { %v762_v20 = vsel %vm232_vm1, %v758_v19, 0.0 }
 0x820   :  { %763 = vadd.xlane.f32.xlu0 %v762_v20 }
 0x8a9   :  { %v761_v27 = vpop.xlane.xlu0 %760 }
 0x8aa   :  { %v765_v28 = vmul.f32 0.03125, %v761_v27 }
 0x8ac   :  { %v767_v29 = vadd.f32 1e-06, %v765_v28 }
 0x8ad   :  { %v764_v18 = vpop.xlane.xlu0 %763 }
 0x8ae   :  { %2218 = vrsqrt.f32 %v767_v29  ;;  %v766_v30 = vmul.f32 0.03125, %v764_v18 }
 0x8b0   :  { %v768_v31 = vadd.f32 1e-06, %v766_v30 }
 0x8b2   :  { %2220 = vrsqrt.f32 %v768_v31 }
 0x8b8   :  { %v2219_v33 = vpop.eup %2218 }
 0x8b9   :  { %v771_v34 = vmul.f32 %v2219_v33, %v755_v14 }
 0x8bb   :  { %v779_v39 = vmul.f32 %v1894_v35, %v771_v34 }
 0x8bc   :  { %v2221_v38 = vpop.eup %2220 }
 0x8bd   :  { %v772_v41 = vmul.f32 %v2221_v38, %v756_v17  ;;  %v787_v44 = vadd.f32 %v1895_v42, %v779_v39 }
 0x8bf   :  { %v780_v43 = vmul.f32 %v1894_v35, %v772_v41 }
 0x8c1   :  { %v788_v45 = vadd.f32 %v1895_v42, %v780_v43 }
 0x8c3   :  { %v793_v46 = vpack.c.bf16 %v788_v45, %v787_v44 }
 0x8c5   :  { %2062 = vmatmul.mubr.msk.bf16.vlgmr.msra.gmra.mrb[4].mxu0 %vm232_vm1, %v793_v46 }
 0x8c6   :  { %2081 = vmatprep.mubr.msk.bf16.mxu0 %vm2288_vm2, %v2287_v40 }
 0x998   :  { %v850_v54 = vpop.f32.mrb[4].mxu0 }
 0x999   :  { %v851_v55 = vadd.f32 %v1896_v52, %v850_v54  ;;  %v2063_v56 = vpop.f32.mrb[5].mxu0 }
 0x99a   :  { %v853_v58 = vpop.f32.mrb[6].mxu0 }
 0x99b   :  { %v857_v59 = vmul.f32 0.70710677, %v851_v55  ;;  %v854_v61 = vadd.f32 %v1896_v52, %v853_v58  ;;  %v2064_v62 = vpop.f32.mrb[7].mxu0  ;;  %v905_v58 = vmul.f32 0.5, %v851_v55 }
 0x99d   :  { %v859_v63 = vand.u32 2147483647, %v857_v59  ;;  %v858_v2 = vmul.f32 0.70710677, %v854_v61  ;;  %vm899_vm12 = vcmp.ge.f32.partialorder %v857_v59, 0.0  ;;  %v906_v62 = vmul.f32 0.5, %v854_v61 }
 0x99f   :  { %v861_v3 = vmul.f32 0.3275911, %v859_v63  ;;  %v860_v4 = vand.u32 2147483647, %v858_v2  ;;  %v887_v11 = vsub.f32 0.0, %v859_v63  ;;  %vm900_vm13 = vcmp.ge.f32.partialorder %v858_v2, 0.0 }
 0x9a1   :  { %v863_v7 = vadd.f32 1.0, %v861_v3  ;;  %v862_v8 = vmul.f32 0.3275911, %v860_v4  ;;  %v888_v12 = vsub.f32 0.0, %v860_v4  ;;  %v889_v14 = vmul.f32 %v887_v11, %v859_v63 }
 0x9a3   :  { %2222 = vrcp.f32 %v863_v7  ;;  %v864_v9 = vadd.f32 1.0, %v862_v8  ;;  %v890_v17 = vmul.f32 %v888_v12, %v860_v4  ;;  %v891_v25 = vmul.f32 1.442695, %v889_v14  ;;  %v1900_v8 = vld [vmem:[%s2918_s16] ss:$0 sm:$0xff] }
 0x9a5   :  { %2224 = vrcp.f32 %v864_v9  ;;  %v893_v27 = vmul.f32 1.442695, %v890_v17 }
 0x9a6   :  { %2226 = vpow2.f32 %v891_v25 }
 0x9a7   :  { %2228 = vpow2.f32 %v893_v27  ;;  %v2170_v27 = vld [vmem:[%s2939_s0 + $0x10] sm:$0xff]  }
 0x9a8   :  { %2078 = vmatpush3.bf16.msra.mxu0 %v2170_v27 }
 0x9a9   :  { %2079 = vmatprep.subr.bf16.mxu0 %v2287_v40 }
 0x9ad   :  { %v2223_v13 = vpop.eup %2222 }
 0x9ae   :  { %v869_v15 = vmul.f32 1.0614054, %v2223_v13 }
 0x9af   :  { %v2225_v22 = vpop.eup %2224 }
 0x9b0   :  { %v871_v16 = vadd.f32 -1.4531521, %v869_v15  ;;  %v870_v19 = vmul.f32 1.0614054, %v2225_v22  ;;  %v2227_v41 = vpop.eup %2226 }
 0x9b1   :  { %v2229_v45 = vpop.eup %2228 }
 0x9b2   :  { %v873_v20 = vmul.f32 %v2223_v13, %v871_v16  ;;  %v872_v24 = vadd.f32 -1.4531521, %v870_v19 }
 0x9b4   :  { %v875_v26 = vadd.f32 1.4214138, %v873_v20  ;;  %v874_v28 = vmul.f32 %v2225_v22, %v872_v24 }
 0x9b6   :  { %v877_v29 = vmul.f32 %v2223_v13, %v875_v26  ;;  %v876_v18 = vadd.f32 1.4214138, %v874_v28  ;;  %v2171_v28 = vld [vmem:[%s2939_s0 + $0x18] sm:$0xff]  }
 0x9b7   :  { %2080 = vmatpush3.bf16.msra.mxu0 %v2171_v28 }
 0x9b8   :  { %v879_v30 = vadd.f32 -0.28449672, %v877_v29  ;;  %v878_v31 = vmul.f32 %v2225_v22, %v876_v18 }
 0x9ba   :  { %v881_v33 = vmul.f32 %v2223_v13, %v879_v30  ;;  %v880_v34 = vadd.f32 -0.28449672, %v878_v31 }
 0x9bc   :  { %v883_v35 = vadd.f32 0.2548296, %v881_v33  ;;  %v882_v38 = vmul.f32 %v2225_v22, %v880_v34 }
 0x9be   :  { %v885_v39 = vmul.f32 %v2223_v13, %v883_v35  ;;  %v884_v42 = vadd.f32 0.2548296, %v882_v38  ;;  %v1908_v38 = vld [vmem:[%s2940_s7 + $0x1] ss:$0 sm:$0xff] }
 0x9c0   :  { %v895_v43 = vmul.f32 %v2227_v41, %v885_v39  ;;  %v886_v44 = vmul.f32 %v2225_v22, %v884_v42  ;;  %v1909_v41 = vld [vmem:[%s2941_s4 + $0x1] ss:$0 sm:$0xff] }
 0x9c2   :  { %v897_v46 = vsub.f32 1.0, %v895_v43  ;;  %v896_v47 = vmul.f32 %v2229_v45, %v886_v44 }
 0x9c4   :  { %v901_v49 = vsub.f32 0.0, %v897_v46  ;;  %v898_v50 = vsub.f32 1.0, %v896_v47 }
 0x9c6   :  { %v903_v51 = vsel %vm899_vm12, %v897_v46, %v901_v49  ;;  %v902_v52 = vsub.f32 0.0, %v898_v50 }
 0x9c7   :  { %v907_v54 = vadd.f32 1.0, %v903_v51 }
 0x9c8   :  { %v904_v56 = vsel %vm900_vm13, %v898_v50, %v902_v52  ;;  %v1915_v50 = vld [vmem:[%s2908_s8 + $0x1] ss:$0 sm:$0xff] }
 0x9c9   :  { %v908_v63 = vadd.f32 1.0, %v904_v56  ;;  %v909_v3 = vmul.f32 %v907_v54, %v905_v58 }
 0x9cb   :  { %v910_v4 = vmul.f32 %v908_v63, %v906_v62 }
 0x9cd   :  { %v919_v7 = vpack.c.bf16 %v910_v4, %v909_v3 }
 0x9cf   :  { %2074 = vmatmul.mubr.msk.bf16.vlgmr.msra.gmra.mrb[24].mxu1 %vm173_vm0, %v919_v7 }
 0xaa2   :  { %v988_v9 = vpop.f32.mrb[24].mxu1 }
 0xaa3   :  { %v989_v59 = vadd.f32 %v1900_v8, %v988_v9  ;;  %v2075_v11 = vpop.f32.mrb[25].mxu1 }
 0xaa4   :  { %v991_v12 = vpop.f32.mrb[26].mxu1 }
 0xaa5   :  { %v2698_v13 = vadd.f32 %v989_v59, %v2645_v6  ;;  %v992_v2 = vadd.f32 %v1900_v8, %v991_v12  ;;  %v2076_v55 = vpop.f32.mrb[27].mxu1 }
 0xaa7   :  { %v2701_v61 = vadd.f32 %v992_v2, %v2648_v10  ;;  %v1001_v14 = vsel %vm232_vm1, %v2698_v13, 0.0 }
 0xaa8   :  { %1002 = vadd.xlane.f32.xlu0 %v1001_v14 }
 0xaa9   :  { %v1004_v15 = vsel %vm232_vm1, %v2701_v61, 0.0 }
 0xaaa   :  { %1005 = vadd.xlane.f32.xlu1 %v1004_v15 }
 0xb35   :  { %v1003_v22 = vpop.xlane.xlu0 %1002 }
 0xb36   :  { %v1007_v16 = vmul.f32 0.03125, %v1003_v22 }
 0xb37   :  { %v1006_v17 = vpop.xlane.xlu1 %1005 }
 0xb38   :  { %v1009_v25 = vsub.f32 %v2698_v13, %v1007_v16  ;;  %v1008_v6 = vmul.f32 0.03125, %v1006_v17 }
 0xb3a   :  { %v1010_v19 = vsub.f32 %v2701_v61, %v1008_v6  ;;  %v1011_v20 = vmul.f32 %v1009_v25, %v1009_v25 }
 0xb3c   :  { %v1013_v10 = vsel %vm232_vm1, %v1011_v20, 0.0  ;;  %v1012_v24 = vmul.f32 %v1010_v19, %v1010_v19 }
 0xb3d   :  { %1014 = vadd.xlane.f32.xlu0 %v1013_v10 }
 0xb3e   :  { %v1016_v26 = vsel %vm232_vm1, %v1012_v24, 0.0 }
 0xb41   :  { %1017 = vadd.xlane.f32.xlu0 %v1016_v26 }
 0xbca   :  { %v1015_v29 = vpop.xlane.xlu0 %1014 }
 0xbcb   :  { %v1019_v18 = vmul.f32 0.03125, %v1015_v29 }
 0xbcd   :  { %v1021_v30 = vadd.f32 1e-06, %v1019_v18 }
 0xbce   :  { %v1018_v31 = vpop.xlane.xlu0 %1017 }
 0xbcf   :  { %2230 = vrsqrt.f32 %v1021_v30  ;;  %v1020_v33 = vmul.f32 0.03125, %v1018_v31 }
 0xbd1   :  { %v1022_v34 = vadd.f32 1e-06, %v1020_v33 }
 0xbd3   :  { %2232 = vrsqrt.f32 %v1022_v34 }
 0xbd9   :  { %v2231_v35 = vpop.eup %2230 }
 0xbda   :  { %v1025_v39 = vmul.f32 %v2231_v35, %v1009_v25 }
 0xbdc   :  { %v1033_v42 = vmul.f32 %v1908_v38, %v1025_v39 }
 0xbdd   :  { %v2233_v43 = vpop.eup %2232 }
 0xbde   :  { %v1026_v44 = vmul.f32 %v2233_v43, %v1010_v19  ;;  %v1041_v45 = vadd.f32 %v1909_v41, %v1033_v42 }
 0xbe0   :  { %v1034_v46 = vmul.f32 %v1908_v38, %v1026_v44 }
 0xbe2   :  { %v1042_v47 = vadd.f32 %v1909_v41, %v1034_v46 }
 0xbe4   :  { %v1048_v49 = vpack.c.bf16 %v1042_v47, %v1041_v45 }
 0xbe6   :  { %2082 = vmatmul.mubr.msk.bf16.vlgmr.msra.gmra.mrb[8].mxu0 %vm232_vm1, %v1048_v49 }
 0xcb9   :  { %v1106_v51 = vpop.f32.mrb[8].mxu0 }
 0xcba   :  { %v1107_v52 = vadd.f32 %v1915_v50, %v1106_v51  ;;  %v2083_v54 = vpop.f32.mrb[9].mxu0 }
 0xcbb   :  { %v1109_v56 = vpop.f32.mrb[10].mxu0 }
 0xcbc   :  { %v1110_v58 = vadd.f32 %v1915_v50, %v1109_v56  ;;  %v2084_v62 = vpop.f32.mrb[11].mxu0  ;;  %v1115_v63 = vmul.f32 %v2494_v60, %v1107_v52  ;;  %v1113_v3 = vmul.f32 %v2499_v0, %v1107_v52  ;;  %v1117_v4 = vmul.f32 %v2504_v1, %v1107_v52 }
 0xcbd   :  { %v1119_v11 = vmul.f32 %v2509_v5, %v1107_v52 }
 0xcbe   :  { %v1116_v7 = vmul.f32 %v2494_v60, %v1110_v58  ;;  %v2732_v8 = vpack.c.bf16 %v1110_v58, %v1107_v52  ;;  %v1114_v9 = vmul.f32 %v2499_v0, %v1110_v58  ;;  %v1118_v59 = vmul.f32 %v2504_v1, %v1110_v58 }
 0xcbf   :  { %v1120_v12 = vmul.f32 %v2509_v5, %v1110_v58 }
 0xcc0   :  { %1127 = vrot.lane.b32.xlu0 %v2732_v8, %s2289_s28  ;;  %v1121_v2 = vpack.c.bf16 %v1114_v9, %v1113_v3  ;;  %v1122_v55 = vpack.c.bf16 %v1116_v7, %v1115_v63  ;;  %v1123_v14 = vpack.c.bf16 %v1118_v59, %v1117_v4 }
 0xcc1   :  { %v1124_v15 = vpack.c.bf16 %v1120_v12, %v1119_v11 }
 0xcc2   :  { %2087 = vmatprep.mubr.msk.bf16.mxu0 %vm232_vm1, %v1121_v2 }
 0xd32   :  { %v1128_v60 = vpop.permute.xlu0 %1127 }
 0xd33   :  { %v1142_v22 = vsel %vm232_vm1, %v1128_v60, 0  ;;  %2142 = vmatprep.subr.msk.bf16.mxu0 %vm232_vm1, %v1128_v60 }
 0xd34   :  { %2086 = vmatpush3.bf16.xpose.msra.mxu0 %v1142_v22 }
 0xd35   :  { %2105 = vmatprep.subr.bf16.mxu0 %v2287_v40 }
 0xd3b   :  { %2088 = vmatmul.mubr.msk.bf16.vlgmr.msra.gmra.mrb[12].mxu0 %vm232_vm1, %v1122_v55 }
 0xd3c   :  { %2091 = vmatprep.mubr.msk.bf16.mxu0 %vm232_vm1, %v1123_v14 }
 0xd43   :  { %2092 = vmatmul.mubr.msk.bf16.gmra.mrb[16].mxu0 %vm232_vm1, %v1124_v15 }
 0xd44   :  { %2109 = vmatprep.mubr.msk.bf16.mxu0 %vm2288_vm2, %v2287_v40 }
 0xe0e   :  { %v2089_v0 = vpop.f32.mrb[12].mxu0 }
 0xe0f   :  { %v1211_v1 = vmul.f32 0.35355338, %v2089_v0  ;;  %v1178_v5 = vpop.f32.mrb[13].mxu0 }
 0xe10   :  { %v1209_v16 = vmul.f32 0.35355338, %v1178_v5  ;;  %v2090_v17 = vpop.f32.mrb[14].mxu0 }
 0xe11   :  { %v1212_v25 = vmul.f32 0.35355338, %v2090_v17  ;;  %v1181_v6 = vpop.f32.mrb[15].mxu0  ;;  %v1219_v19 = vsel %vm474_vm3, %v1211_v1, -1e+30 }
 0xe12   :  { %v1231_v20 = vsel %vm488_vm4, %v1219_v19, -inf  ;;  %v1217_v10 = vsel %vm472_vm5, %v1209_v16, -1e+30  ;;  %v1210_v24 = vmul.f32 0.35355338, %v1181_v6 }
 0xe13   :  { %1232 = vmax.xlane.f32.xlu1 %v1231_v20  ;;  %v1225_v26 = vsel %vm488_vm4, %v1217_v10, -inf  ;;  %v1220_v27 = vsel %vm475_vm6, %v1212_v25, -1e+30 }
 0xe14   :  { %1226 = vmax.xlane.f32.xlu0 %v1225_v26  ;;  %v1234_v29 = vsel %vm488_vm4, %v1220_v27, -inf  ;;  %v1218_v30 = vsel %vm473_vm8, %v1210_v24, -1e+30 }
 0xe15   :  { %v1228_v33 = vsel %vm488_vm4, %v1218_v30, -inf }
 0xe16   :  { %v2093_v28 = vpop.f32.mrb[16].mxu0 }
 0xe17   :  { %v1215_v18 = vmul.f32 0.35355338, %v2093_v28  ;;  %1235 = vmax.xlane.f32.xlu1 %v1234_v29  ;;  %v1194_v21 = vpop.f32.mrb[17].mxu0 }
 0xe18   :  { %v2094_v31 = vpop.f32.mrb[18].mxu0  ;;  %v1213_v34 = vmul.f32 0.35355338, %v1194_v21 }
 0xe19   :  { %v1197_v23 = vpop.f32.mrb[19].mxu0  ;;  %v1223_v32 = vsel %vm478_vm7, %v1215_v18, -1e+30  ;;  %v1216_v37 = vmul.f32 0.35355338, %v2094_v31 }
 0xe1a   :  { %v1243_v35 = vsel %vm488_vm4, %v1223_v32, -inf  ;;  %v1214_v38 = vmul.f32 0.35355338, %v1197_v23  ;;  %v1221_v39 = vsel %vm476_vm9, %v1213_v34, -1e+30 }
 0xe1b   :  { %1229 = vmax.xlane.f32.xlu1 %v1228_v33  ;;  %v1237_v41 = vsel %vm488_vm4, %v1221_v39, -inf  ;;  %v1224_v36 = vsel %vm479_vm11, %v1216_v37, -1e+30 }
 0xe1c   :  { %v1222_v42 = vsel %vm477_vm10, %v1214_v38, -1e+30  ;;  %v1246_v44 = vsel %vm488_vm4, %v1224_v36, -inf }
 0xe1d   :  { %v1240_v43 = vsel %vm488_vm4, %v1222_v42, -inf }
 0xe1f   :  { %1244 = vmax.xlane.f32.xlu1 %v1243_v35 }
 0xe23   :  { %1238 = vmax.xlane.f32.xlu1 %v1237_v41 }
 0xe27   :  { %1241 = vmax.xlane.f32.xlu1 %v1240_v43 }
 0xe2b   :  { %1247 = vmax.xlane.f32.xlu1 %v1246_v44 }
 0xea0   :  { %v1233_v45 = vpop.xlane.xlu1 %1232 }
 0xea1   :  { %v1251_v46 = vsub.f32 %v1219_v19, %v1233_v45  ;;  %v1227_v48 = vpop.xlane.xlu0 %1226 }
 0xea2   :  { %v1249_v47 = vsub.f32 %v1217_v10, %v1227_v48 }
 0xea3   :  { %v1261_v49 = vmul.f32 1.442695, %v1251_v46 }
 0xea4   :  { %v1257_v50 = vmul.f32 1.442695, %v1249_v47  ;;  %v1236_v51 = vpop.xlane.xlu1 %1235 }
 0xea5   :  { %2234 = vpow2.f32 %v1261_v49  ;;  %v1252_v53 = vsub.f32 %v1220_v27, %v1236_v51 }
 0xea6   :  { %2236 = vpow2.f32 %v1257_v50 }
 0xea7   :  { %v1263_v56 = vmul.f32 1.442695, %v1252_v53 }
 0xea8   :  { %v1230_v52 = vpop.xlane.xlu1 %1229 }
 0xea9   :  { %v1250_v54 = vsub.f32 %v1218_v30, %v1230_v52  ;;  %v2172_v52 = vld [vmem:[%s2911_s9 + $0x10] sm:$0xff]  }
 0xeaa   :  { %2106 = vmatpush3.bf16.msra.mxu0 %v2172_v52 }
 0xeab   :  { %v1259_v58 = vmul.f32 1.442695, %v1250_v54  ;;  %2107 = vmatprep.subr.bf16.mxu0 %v2287_v40  ;;  %v2173_v54 = vld [vmem:[%s2911_s9 + $0x18] sm:$0xff]  }
 0xeac   :  { %v1245_v62 = vpop.xlane.xlu1 %1244 }
 0xead   :  { %2238 = vpow2.f32 %v1259_v58  ;;  %v1255_v57 = vsub.f32 %v1223_v32, %v1245_v62  ;;  %v2282_v58 = vld [vmem:[%s2909_s3 + $0x1] ss:$0 sm:$0xff] }
 0xeae   :  { %2240 = vpow2.f32 %v1263_v56  ;;  %2108 = vmatpush3.bf16.msra.mxu0 %v2173_v54  ;;  %v1939_v54 = vld [vmem:[%s2915_s12 + $0x1] ss:$0 sm:$0xff] }
 0xeaf   :  { %v2773_v63 = vpop.eup %2234  ;;  %v1269_v3 = vmul.f32 1.442695, %v1255_v57  ;;  %2121 = vmatprep.subr.bf16.mxu0 %v2287_v40 }
 0xeb0   :  { %v1239_v4 = vpop.xlane.xlu1 %1238  ;;  %v1279_v7 = vsel %vm488_vm4, %v2773_v63, 0.0  ;;  %v2237_v9 = vpop.eup %2236 }
 0xeb1   :  { %2242 = vpow2.f32 %v1269_v3  ;;  %v1253_v59 = vsub.f32 %v1221_v39, %v1239_v4  ;;  %1280 = vadd.xlane.f32.xlu1 %v1279_v7  ;;  %v1273_v2 = vsel %vm488_vm4, %v2237_v9, 0.0 }
 0xeb3   :  { %v1265_v11 = vmul.f32 1.442695, %v1253_v59 }
 0xeb4   :  { %v1242_v12 = vpop.xlane.xlu1 %1241 }
 0xeb5   :  { %2244 = vpow2.f32 %v1265_v11  ;;  %v1254_v55 = vsub.f32 %v1222_v42, %v1242_v12  ;;  %1274 = vadd.xlane.f32.xlu1 %v1273_v2 }
 0xeb7   :  { %v2239_v14 = vpop.eup %2238  ;;  %v1267_v15 = vmul.f32 1.442695, %v1254_v55 }
 0xeb8   :  { %v1248_v60 = vpop.xlane.xlu1 %1247  ;;  %v1276_v22 = vsel %vm488_vm4, %v2239_v14, 0.0  ;;  %v2241_v0 = vpop.eup %2240 }
 0xeb9   :  { %2246 = vpow2.f32 %v1267_v15  ;;  %v1256_v1 = vsub.f32 %v1224_v36, %v1248_v60  ;;  %1277 = vadd.xlane.f32.xlu0 %v1276_v22  ;;  %v1282_v17 = vsel %vm488_vm4, %v2241_v0, 0.0 }
 0xebb   :  { %v2243_v5 = vpop.eup %2242  ;;  %v1271_v16 = vmul.f32 1.442695, %v1256_v1 }
 0xebc   :  { %v1291_v25 = vsel %vm488_vm4, %v2243_v5, 0.0 }
 0xebd   :  { %2248 = vpow2.f32 %v1271_v16  ;;  %1283 = vadd.xlane.f32.xlu0 %v1282_v17  ;;  %1292 = vadd.xlane.f32.xlu1 %v1291_v25 }
 0xebf   :  { %v2245_v6 = vpop.eup %2244 }
 0xec0   :  { %v1285_v19 = vsel %vm488_vm4, %v2245_v6, 0.0 }
 0xec1   :  { %1286 = vadd.xlane.f32.xlu1 %v1285_v19 }
 0xec3   :  { %v2247_v20 = vpop.eup %2246 }
 0xec4   :  { %v1288_v10 = vsel %vm488_vm4, %v2247_v20, 0.0 }
 0xec5   :  { %1289 = vadd.xlane.f32.xlu0 %v1288_v10  ;;  %v1932_v10 = vld [vmem:[%s2912_s10 + $0x1] ss:$0 sm:$0xff] }
 0xec7   :  { %v2249_v24 = vpop.eup %2248 }
 0xec8   :  { %v1294_v26 = vsel %vm488_vm4, %v2249_v24, 0.0 }
 0xec9   :  { %1295 = vadd.xlane.f32.xlu0 %v1294_v26 }
 0xed2   :  { %1317 = vrot.lane.b32.xlu1 %v2732_v8, %s2290_s2 }
 0xf3e   :  { %v1281_v27 = vpop.xlane.xlu1 %1280 }
 0xf42   :  { %v1275_v28 = vpop.xlane.xlu1 %1274 }
 0xf43   :  { %2250 = vrcp.f32 %v1275_v28 }
 0xf46   :  { %v1278_v29 = vpop.xlane.xlu0 %1277 }
 0xf47   :  { %2252 = vrcp.f32 %v1278_v29 }
 0xf48   :  { %2254 = vrcp.f32 %v1281_v27 }
 0xf4a   :  { %v1284_v18 = vpop.xlane.xlu0 %1283  ;;  %v1293_v21 = vpop.xlane.xlu1 %1292 }
 0xf4b   :  { %2256 = vrcp.f32 %v1284_v18 }
 0xf4d   :  { %v2251_v31 = vpop.eup %2250 }
 0xf4e   :  { %v1287_v30 = vpop.xlane.xlu1 %1286  ;;  %v1305_v32 = vmul.f32 %v2251_v31, %v2237_v9 }
 0xf4f   :  { %2258 = vrcp.f32 %v1287_v30 }
 0xf51   :  { %v2253_v23 = vpop.eup %2252 }
 0xf52   :  { %v1290_v33 = vpop.xlane.xlu0 %1289  ;;  %v1318_v34 = vpop.permute.xlu1 %1317  ;;  %v1306_v35 = vmul.f32 %v2253_v23, %v2239_v14  ;;  %v2284_v14 = vld [vmem:[%s2909_s3 + $0x2] ss:$0 sm:$0xff] }
 0xf53   :  { %v2255_v38 = vpop.eup %2254  ;;  %2260 = vrcp.f32 %v1290_v33  ;;  %2095 = vmatprep.subr.bf16.mxu1 %v1318_v34 }
 0xf54   :  { %2096 = vmatpush3.bf16.msra.mxu1 %v1318_v34  ;;  %v1313_v8 = vpack.c.bf16 %v1306_v35, %v1305_v32  ;;  %2262 = vrcp.f32 %v1293_v21  ;;  %v1307_v41 = vmul.f32 %v2255_v38, %v2773_v63  ;;  %v2283_v63 = vld [vmem:[%s2909_s3] ss:$0 sm:$0xff] }
 0xf55   :  { %v2257_v39 = vpop.eup %2256  ;;  %2113 = vmatprep.subr.bf16.mxu1 %v2287_v40 }
 0xf56   :  { %v1308_v37 = vmul.f32 %v2257_v39, %v2241_v0  ;;  %v1296_v42 = vpop.xlane.xlu0 %1295  ;;  %2097 = vmatprep.mubr.msk.bf16.mxu1 %vm488_vm4, %v1313_v8  ;;  %v2285_v0 = vld [vmem:[%s2909_s3 + $0x3] ss:$0 sm:$0xff] }
 0xf57   :  { %2264 = vrcp.f32 %v1296_v42  ;;  %v2175_v42 = vld [vmem:[%s2913_s13 + $0x18] sm:$0xff]  }
 0xf58   :  { %v1314_v43 = vpack.c.bf16 %v1308_v37, %v1307_v41  ;;  %v2174_v37 = vld [vmem:[%s2913_s13 + $0x10] sm:$0xff]  }
 0xf59   :  { %v2259_v36 = vpop.eup %2258 }
 0xf5a   :  { %2098 = vmatmul.mubr.msk.bf16.vlgmr.msra.gmra.mrb[28].mxu1 %vm488_vm4, %v1314_v43  ;;  %v1309_v45 = vmul.f32 %v2259_v36, %v2245_v6 }
 0xf5b   :  { %2114 = vmatpush3.bf16.msra.mxu1 %v2174_v37 }
 0xf5c   :  { %2115 = vmatprep.subr.bf16.mxu1 %v2287_v40 }
 0xf5d   :  { %v2261_v44 = vpop.eup %2260 }
 0xf5e   :  { %v1310_v46 = vmul.f32 %v2261_v44, %v2247_v20  ;;  %v2263_v48 = vpop.eup %2262 }
 0xf5f   :  { %v1311_v50 = vmul.f32 %v2263_v48, %v2243_v5  ;;  %2116 = vmatpush3.bf16.msra.mxu1 %v2175_v42 }
 0xf60   :  { %v1315_v47 = vpack.c.bf16 %v1310_v46, %v1309_v45  ;;  %2133 = vmatprep.subr.bf16.mxu1 %v2287_v40 }
 0xf61   :  { %v2265_v49 = vpop.eup %2264 }
 0xf62   :  { %2101 = vmatprep.mubr.msk.bf16.mxu1 %vm488_vm4, %v1315_v47  ;;  %v1312_v51 = vmul.f32 %v2265_v49, %v2249_v24 }
 0xf64   :  { %v1316_v53 = vpack.c.bf16 %v1312_v51, %v1311_v50  ;;  %v1938_v50 = vld [vmem:[%s2914_s11 + $0x1] ss:$0 sm:$0xff] }
 0xf66   :  { %2102 = vmatmul.mubr.msk.bf16.gmra.mrb[32].mxu1 %vm488_vm4, %v1316_v53 }
 0xf67   :  { %2117 = vmatprep.mubr.msk.bf16.mxu1 %vm2288_vm2, %v2287_v40 }
0x102d   :  { %v2099_v56 = vpop.f32.mrb[28].mxu1 }
0x102e   :  { %v1399_v62 = vmul.f32 %v2282_v58, %v2099_v56  ;;  %v1366_v57 = vpop.f32.mrb[29].mxu1 }
0x102f   :  { %v1397_v3 = vmul.f32 %v2283_v63, %v1366_v57  ;;  %v2100_v4 = vpop.f32.mrb[30].mxu1 }
0x1030   :  { %v1400_v7 = vmul.f32 %v2282_v58, %v2100_v4  ;;  %v1369_v9 = vpop.f32.mrb[31].mxu1  ;;  %v2178_v4 = vld [vmem:[%s2916_s15 + $0x30] sm:$0xff]  }
0x1031   :  { %v1401_v59 = vadd.f32 %v1399_v62, %v1397_v3  ;;  %v1398_v11 = vmul.f32 %v2283_v63, %v1369_v9  ;;  %v2176_v63 = vld [vmem:[%s2916_s15 + $0x20] sm:$0xff]   ;;  %v2177_v3 = vld [vmem:[%s2916_s15 + $0x28] sm:$0xff]  }
0x1032   :  { %v1945_v9 = vld [vmem:[%s2917_s14 + $0x1] ss:$0 sm:$0xff] }
0x1033   :  { %v1402_v12 = vadd.f32 %v1400_v7, %v1398_v11  ;;  %v2179_v7 = vld [vmem:[%s2916_s15 + $0x38] sm:$0xff]  }
0x1039   :  { %v2103_v2 = vpop.f32.mrb[32].mxu1 }
0x103a   :  { %v1382_v55 = vpop.f32.mrb[33].mxu1  ;;  %v1407_v1 = vmul.f32 %v2285_v0, %v2103_v2 }
0x103b   :  { %v1403_v15 = vmul.f32 %v2284_v14, %v1382_v55  ;;  %v2104_v60 = vpop.f32.mrb[34].mxu1 }
0x103c   :  { %v1385_v22 = vpop.f32.mrb[35].mxu1  ;;  %v1408_v25 = vmul.f32 %v2285_v0, %v2104_v60 }
0x103d   :  { %v1405_v5 = vadd.f32 %v1403_v15, %v1401_v59  ;;  %v1404_v16 = vmul.f32 %v2284_v14, %v1385_v22 }
0x103f   :  { %v1409_v17 = vadd.f32 %v1407_v1, %v1405_v5  ;;  %v1406_v6 = vadd.f32 %v1404_v16, %v1402_v12 }
0x1041   :  { %v1410_v19 = vadd.f32 %v1408_v25, %v1406_v6 }
0x1043   :  { %v1416_v20 = vpack.c.bf16 %v1410_v19, %v1409_v17 }
0x1045   :  { %2110 = vmatmul.mubr.msk.bf16.vlgmr.msra.gmra.mrb[20].mxu0 %vm232_vm1, %v1416_v20 }
0x1046   :  { %2129 = vmatprep.mubr.msk.bf16.mxu0 %vm2288_vm2, %v2287_v40  ;;  %2122 = vmatpush3.bf16.msra.mxu0 %v2176_v63 }
0x1047   :  { %2123 = vmatprep.subr.bf16.mxu0 %v2287_v40 }
0x104a   :  { %2124 = vmatpush3.bf16.msra.mxu0 %v2177_v3  ;;  %v1958_v3 = vld [vmem:[%s2918_s16 + $0x1] ss:$0 sm:$0xff] }
0x104b   :  { %2125 = vmatprep.subr.bf16.mxu0 %v2287_v40 }
0x104e   :  { %2126 = vmatpush3.bf16.msra.mxu0 %v2178_v4 }
0x104f   :  { %2127 = vmatprep.subr.bf16.mxu0 %v2287_v40 }
0x1052   :  { %2128 = vmatpush3.bf16.msra.mxu0 %v2179_v7 }
0x1118   :  { %v1474_v24 = vpop.f32.mrb[20].mxu0 }
0x1119   :  { %v1475_v26 = vadd.f32 %v1932_v10, %v1474_v24  ;;  %v2111_v27 = vpop.f32.mrb[21].mxu0 }
0x111a   :  { %v1477_v28 = vpop.f32.mrb[22].mxu0 }
0x111b   :  { %v2821_v29 = vadd.f32 %v1475_v26, %v2698_v13  ;;  %v1478_v18 = vadd.f32 %v1932_v10, %v1477_v28  ;;  %v2112_v21 = vpop.f32.mrb[23].mxu0 }
0x111d   :  { %v2824_v30 = vadd.f32 %v1478_v18, %v2701_v61  ;;  %v1487_v31 = vsel %vm232_vm1, %v2821_v29, 0.0 }
0x111e   :  { %1488 = vadd.xlane.f32.xlu0 %v1487_v31 }
0x111f   :  { %v1490_v23 = vsel %vm232_vm1, %v2824_v30, 0.0 }
0x1122   :  { %1491 = vadd.xlane.f32.xlu0 %v1490_v23 }
0x11ab   :  { %v1489_v33 = vpop.xlane.xlu0 %1488 }
0x11ac   :  { %v1493_v34 = vmul.f32 0.03125, %v1489_v33 }
0x11ae   :  { %v1495_v32 = vsub.f32 %v2821_v29, %v1493_v34 }
0x11af   :  { %v1492_v35 = vpop.xlane.xlu0 %1491 }
0x11b0   :  { %v1494_v13 = vmul.f32 0.03125, %v1492_v35  ;;  %v1497_v38 = vmul.f32 %v1495_v32, %v1495_v32 }
0x11b2   :  { %v1496_v8 = vsub.f32 %v2824_v30, %v1494_v13  ;;  %v1499_v61 = vsel %vm232_vm1, %v1497_v38, 0.0 }
0x11b3   :  { %1500 = vadd.xlane.f32.xlu0 %v1499_v61 }
0x11b4   :  { %v1498_v39 = vmul.f32 %v1496_v8, %v1496_v8 }
0x11b6   :  { %v1502_v41 = vsel %vm232_vm1, %v1498_v39, 0.0 }
0x11b7   :  { %1503 = vadd.xlane.f32.xlu0 %v1502_v41 }
0x1240   :  { %v1501_v43 = vpop.xlane.xlu0 %1500 }
0x1241   :  { %v1505_v36 = vmul.f32 0.03125, %v1501_v43 }
0x1243   :  { %v1507_v44 = vadd.f32 1e-06, %v1505_v36 }
0x1244   :  { %v1504_v45 = vpop.xlane.xlu0 %1503 }
0x1245   :  { %2266 = vrsqrt.f32 %v1507_v44  ;;  %v1506_v46 = vmul.f32 0.03125, %v1504_v45 }
0x1247   :  { %v1508_v48 = vadd.f32 1e-06, %v1506_v46 }
0x1249   :  { %2268 = vrsqrt.f32 %v1508_v48 }
0x124f   :  { %v2267_v47 = vpop.eup %2266 }
0x1250   :  { %v1511_v49 = vmul.f32 %v2267_v47, %v1495_v32 }
0x1252   :  { %v1519_v53 = vmul.f32 %v1938_v50, %v1511_v49 }
0x1253   :  { %v2269_v51 = vpop.eup %2268 }
0x1254   :  { %v1512_v52 = vmul.f32 %v2269_v51, %v1496_v8  ;;  %v1527_v58 = vadd.f32 %v1939_v54, %v1519_v53 }
0x1256   :  { %v1520_v56 = vmul.f32 %v1938_v50, %v1512_v52 }
0x1258   :  { %v1528_v62 = vadd.f32 %v1939_v54, %v1520_v56 }
0x125a   :  { %v1534_v57 = vpack.c.bf16 %v1528_v62, %v1527_v58 }
0x125c   :  { %2118 = vmatmul.mubr.msk.bf16.vlgmr.msra.gmra.mrb[36].mxu1 %vm232_vm1, %v1534_v57 }
0x125d   :  { %2137 = vmatprep.mubr.msk.bf16.mxu1 %vm2288_vm2, %v2287_v40 }
0x132f   :  { %v1592_v59 = vpop.f32.mrb[36].mxu1 }
0x1330   :  { %v1593_v11 = vadd.f32 %v1945_v9, %v1592_v59  ;;  %v2119_v12 = vpop.f32.mrb[37].mxu1 }
0x1331   :  { %v1595_v2 = vpop.f32.mrb[38].mxu1 }
0x1332   :  { %v1599_v55 = vmul.f32 0.70710677, %v1593_v11  ;;  %v1596_v14 = vadd.f32 %v1945_v9, %v1595_v2  ;;  %v2120_v15 = vpop.f32.mrb[39].mxu1  ;;  %v1647_v54 = vmul.f32 0.5, %v1593_v11 }
0x1334   :  { %v1601_v60 = vand.u32 2147483647, %v1599_v55  ;;  %v1600_v22 = vmul.f32 0.70710677, %v1596_v14  ;;  %vm1641_vm14 = vcmp.ge.f32.partialorder %v1599_v55, 0.0  ;;  %v1648_v56 = vmul.f32 0.5, %v1596_v14 }
0x1336   :  { %v1603_v0 = vmul.f32 0.3275911, %v1601_v60  ;;  %v1602_v1 = vand.u32 2147483647, %v1600_v22  ;;  %v1629_v25 = vsub.f32 0.0, %v1601_v60  ;;  %vm1642_vm15 = vcmp.ge.f32.partialorder %v1600_v22, 0.0 }
0x1338   :  { %v1605_v5 = vadd.f32 1.0, %v1603_v0  ;;  %v1604_v16 = vmul.f32 0.3275911, %v1602_v1  ;;  %v1630_v6 = vsub.f32 0.0, %v1602_v1  ;;  %v1631_v20 = vmul.f32 %v1629_v25, %v1601_v60 }
0x133a   :  { %2270 = vrcp.f32 %v1605_v5  ;;  %v1606_v17 = vadd.f32 1.0, %v1604_v16  ;;  %v1632_v27 = vmul.f32 %v1630_v6, %v1602_v1  ;;  %v1633_v28 = vmul.f32 1.442695, %v1631_v20 }
0x133c   :  { %2272 = vrcp.f32 %v1606_v17  ;;  %v1635_v33 = vmul.f32 1.442695, %v1632_v27 }
0x133d   :  { %2274 = vpow2.f32 %v1633_v28 }
0x133e   :  { %2276 = vpow2.f32 %v1635_v33 }
0x1344   :  { %v2271_v19 = vpop.eup %2270 }
0x1345   :  { %v1611_v10 = vmul.f32 1.0614054, %v2271_v19 }
0x1346   :  { %v2273_v24 = vpop.eup %2272 }
0x1347   :  { %v1613_v26 = vadd.f32 -1.4531521, %v1611_v10  ;;  %v1612_v18 = vmul.f32 1.0614054, %v2273_v24  ;;  %v2275_v42 = vpop.eup %2274 }
0x1348   :  { %v2277_v45 = vpop.eup %2276 }
0x1349   :  { %v1615_v21 = vmul.f32 %v2271_v19, %v1613_v26  ;;  %v1614_v31 = vadd.f32 -1.4531521, %v1612_v18 }
0x134b   :  { %v1617_v23 = vadd.f32 1.4214138, %v1615_v21  ;;  %v1616_v34 = vmul.f32 %v2273_v24, %v1614_v31  ;;  %v1964_v31 = vld [vmem:[%s2920_s17] ss:$0 sm:$0xff] }
0x134d   :  { %v1619_v32 = vmul.f32 %v2271_v19, %v1617_v23  ;;  %v1618_v35 = vadd.f32 1.4214138, %v1616_v34  ;;  %v1965_v34 = vld [vmem:[%s2921_s18] ss:$0 sm:$0xff] }
0x134f   :  { %v1621_v13 = vadd.f32 -0.28449672, %v1619_v32  ;;  %v1620_v38 = vmul.f32 %v2273_v24, %v1618_v35 }
0x1351   :  { %v1623_v8 = vmul.f32 %v2271_v19, %v1621_v13  ;;  %v1622_v61 = vadd.f32 -0.28449672, %v1620_v38 }
0x1353   :  { %v1625_v39 = vadd.f32 0.2548296, %v1623_v8  ;;  %v1624_v41 = vmul.f32 %v2273_v24, %v1622_v61  ;;  %v1966_v8 = vld [vmem:[%s2922_s20] ss:$0 sm:$0xff] }
0x1355   :  { %v1627_v37 = vmul.f32 %v2271_v19, %v1625_v39  ;;  %v1626_v43 = vadd.f32 0.2548296, %v1624_v41  ;;  %v2181_v19 = vld [vmem:[%s2919_s19 + $0x8] sm:$0xff]  }
0x1357   :  { %v1637_v36 = vmul.f32 %v2275_v42, %v1627_v37  ;;  %v1628_v44 = vmul.f32 %v2273_v24, %v1626_v43 }
0x1359   :  { %v1639_v46 = vsub.f32 1.0, %v1637_v36  ;;  %v1638_v48 = vmul.f32 %v2277_v45, %v1628_v44 }
0x135b   :  { %v1643_v47 = vsub.f32 0.0, %v1639_v46  ;;  %v1640_v49 = vsub.f32 1.0, %v1638_v48 }
0x135d   :  { %v1645_v50 = vsel %vm1641_vm14, %v1639_v46, %v1643_v47  ;;  %v1644_v51 = vsub.f32 0.0, %v1640_v49 }
0x135e   :  { %v1649_v53 = vadd.f32 1.0, %v1645_v50 }
0x135f   :  { %v1646_v52 = vsel %vm1642_vm15, %v1640_v49, %v1644_v51 }
0x1360   :  { %v1650_v58 = vadd.f32 1.0, %v1646_v52  ;;  %v1651_v62 = vmul.f32 %v1649_v53, %v1647_v54 }
0x1362   :  { %v1652_v57 = vmul.f32 %v1650_v58, %v1648_v56 }
0x1364   :  { %v1662_v63 = vpack.c.bf16 %v1652_v57, %v1651_v62 }
0x1366   :  { %2130 = vmatmul.mubr.msk.bf16.vlgmr.msra.gmra.mrb[24].mxu0 %vm173_vm0, %v1662_v63 }
0x1439   :  { %v1732_v4 = vpop.f32.mrb[24].mxu0 }
0x143a   :  { %v1733_v7 = vadd.f32 %v1958_v3, %v1732_v4  ;;  %v2131_v9 = vpop.f32.mrb[25].mxu0 }
0x143b   :  { %v1735_v59 = vpop.f32.mrb[26].mxu0 }
0x143c   :  { %v1736_v12 = vadd.f32 %v1958_v3, %v1735_v59  ;;  %v2132_v2 = vpop.f32.mrb[27].mxu0  ;;  %v1739_v55 = vadd.f32 %v1733_v7, %v2821_v29 }
0x143e   :  { %v1743_v11 = vsel %vm232_vm1, %v1739_v55, 0.0  ;;  %v1740_v14 = vadd.f32 %v1736_v12, %v2824_v30  ;;  %v2180_v30 = vld [vmem:[%s2919_s19] sm:$0xff]  }
0x143f   :  { %1744 = vadd.xlane.f32.xlu0 %v1743_v11  ;;  %2134 = vmatpush3.bf16.msra.mxu1 %v2180_v30 }
0x1440   :  { %v1746_v15 = vsel %vm232_vm1, %v1740_v14, 0.0  ;;  %2135 = vmatprep.subr.bf16.mxu1 %v2287_v40 }
0x1441   :  { %1747 = vadd.xlane.f32.xlu1 %v1746_v15 }
0x1443   :  { %2136 = vmatpush3.bf16.msra.mxu1 %v2181_v19 }
0x14cc   :  { %v1745_v60 = vpop.xlane.xlu0 %1744 }
0x14cd   :  { %v1749_v22 = vmul.f32 0.03125, %v1745_v60 }
0x14ce   :  { %v1748_v0 = vpop.xlane.xlu1 %1747 }
0x14cf   :  { %v1751_v1 = vsub.f32 %v1739_v55, %v1749_v22  ;;  %v1750_v5 = vmul.f32 0.03125, %v1748_v0 }
0x14d1   :  { %v1752_v16 = vsub.f32 %v1740_v14, %v1750_v5  ;;  %v1753_v17 = vmul.f32 %v1751_v1, %v1751_v1 }
0x14d3   :  { %v1755_v25 = vsel %vm232_vm1, %v1753_v17, 0.0  ;;  %v1754_v6 = vmul.f32 %v1752_v16, %v1752_v16 }
0x14d4   :  { %1756 = vadd.xlane.f32.xlu0 %v1755_v25 }
0x14d5   :  { %v1758_v29 = vsel %vm232_vm1, %v1754_v6, 0.0 }
0x14d8   :  { %1759 = vadd.xlane.f32.xlu0 %v1758_v29 }
0x1561   :  { %v1757_v20 = vpop.xlane.xlu0 %1756 }
0x1562   :  { %v1761_v10 = vmul.f32 0.03125, %v1757_v20 }
0x1564   :  { %v1763_v24 = vadd.f32 1e-06, %v1761_v10 }
0x1565   :  { %v1760_v26 = vpop.xlane.xlu0 %1759 }
0x1566   :  { %2278 = vrsqrt.f32 %v1763_v24  ;;  %v1762_v27 = vmul.f32 0.03125, %v1760_v26 }
0x1568   :  { %v1764_v28 = vadd.f32 1e-06, %v1762_v27 }
0x156a   :  { %2280 = vrsqrt.f32 %v1764_v28 }
0x1570   :  { %v2279_v18 = vpop.eup %2278 }
0x1571   :  { %v1767_v21 = vmul.f32 %v2279_v18, %v1751_v1 }
0x1573   :  { %v1775_v23 = vmul.f32 %v1964_v31, %v1767_v21 }
0x1574   :  { %v2281_v40 = vpop.eup %2280 }
0x1575   :  { %v1768_v33 = vmul.f32 %v2281_v40, %v1752_v16  ;;  %v1783_v35 = vadd.f32 %v1965_v34, %v1775_v23 }
0x1577   :  { %v1776_v32 = vmul.f32 %v1964_v31, %v1768_v33 }
0x1579   :  { %v1784_v13 = vadd.f32 %v1965_v34, %v1776_v32 }
0x157b   :  { %v1789_v38 = vpack.c.bf16 %v1784_v13, %v1783_v35 }
0x157d   :  { %2138 = vmatmul.mubr.msk.bf16.vlgmr.msra.gmra.mrb[40].mxu1 %vm232_vm1, %v1789_v38 }
0x1650   :  { %v1846_v61 = vpop.f32.mrb[40].mxu1 }
0x1651   :  { %v1847_v39 = vadd.f32 %v1966_v8, %v1846_v61  ;;  %v2139_v41 = vpop.f32.mrb[41].mxu1 }
0x1652   :  { %v1849_v37 = vpop.f32.mrb[42].mxu1 }
0x1653   :  { %1853 = vst [vmem:[%s2923_s21] sm:$0xff] %v1847_v39  ;;  %v1850_v42 = vadd.f32 %v1966_v8, %v1849_v37  ;;  %v2140_v43 = vpop.f32.mrb[43].mxu1 }
0x1655   :  { %1854 = vst [vmem:[%s2923_s21 + $0x8] sm:$0xff] %v1850_v42 }

</bundles_post_ra>
